<compile_context>
chip_gen: v7x
topology: tpu7x:2x2x1
jax: 0.10.0
libtpu: 0.0.40
codegen_flags: <defaults>
</compile_context>

<pallas_src>
import math

import jax
import jax.numpy as jnp
import numpy as np
from jax import lax
from jax.experimental import pallas as pl
from jax.experimental.pallas import tpu as pltpu

# ---------------- constants from the reference module ----------------
B_J0 = 0.01          # b_j0
BETA = 1.8           # isAdapt=1 branch
TAU_M = 20.0
TAU_A = 600.0        # tau_a default
DT = 1.0
R_M = 1.0
ALPHA = float(math.exp(-DT / TAU_M))
RO = float(math.exp(-DT / TAU_A))

# ---------------- model sizes (small, consistent with the module) ----------------
N = 2                  # batch
T = 8                  # sequence length
IN_SIZE = 16           # in_size
CFG_FC = (32, 32, 32)  # cfg_fc (args.fc)
N_OUT = 4              # output_size
H1, H2, H3 = CFG_FC

PACK_W = N_OUT + 3 * H3                      # out | s3 | m3 | theta3  = 100
DENSE_W = ((PACK_W + 127) // 128) * 128      # pad to lane-dense 128
FIN_W = 3 * (H1 + H2 + H3)                   # m1..m3 | s1..s3 | b1..b3 = 288


# ---------------- Pallas kernel ----------------
def srnn_alif_kernel(
    # inputs
    x_ref,                       # (T, N, IN)
    w1_ref, b1_ref,              # fused (IN+H1, H1), (1, H1)
    w2_ref, b2_ref,              # fused (H1+H2, H2), (1, H2)
    w3_ref, b3_ref,              # fused (H2+H3, H3), (1, H3)
    wo_ref, bo_ref,              # (H3, N_OUT), (1, N_OUT)
    m1_0, m2_0, m3_0, s1_0, s2_0, s3_0, a1_0, a2_0, a3_0,
    # outputs
    dense_ref,                   # (T*N, DENSE_W)  lane-dense per-step pack
    fin_ref,                     # (N, FIN_W)      packed final state
):
    x_all = x_ref[...]                       # (T, N, IN), loaded once
    w1 = w1_ref[...]; bf1 = b1_ref[...]
    w2 = w2_ref[...]; bf2 = b2_ref[...]
    w3 = w3_ref[...]; bf3 = b3_ref[...]
    wo = wo_ref[...]; bo = bo_ref[...]

    # recurrent state lives in vregs across the unrolled time loop
    m1 = m1_0[...]; m2 = m2_0[...]; m3 = m3_0[...]
    s1 = s1_0[...]; s2 = s2_0[...]; s3 = s3_0[...]
    a1 = a1_0[...]; a2 = a2_0[...]; a3 = a3_0[...]

    t_len, n, _ = x_all.shape

    def alif_step(inp, w_fused, bias_fused, m, s, a):
        # h = i2h(inp) + h2h(spike_old)   (fused single matmul)
        h = jnp.dot(jnp.concatenate([inp, s], axis=-1), w_fused,
                    preferred_element_type=jnp.float32) + bias_fused
        # mem_update_adp
        a_new = RO * a + (1.0 - RO) * s
        theta = B_J0 + BETA * a_new
        m_new = m * ALPHA + (1.0 - ALPHA) * R_M * h - theta * s * DT
        s_new = (m_new - theta > 0.0).astype(jnp.float32)
        return m_new, s_new, a_new, theta

    rows = []
    for t in range(t_len):                   # statically unrolled (T = 8)
        x_t = x_all[t]                       # (N, IN)
        m1, s1, a1, _ = alif_step(x_t, w1, bf1, m1, s1, a1)
        m2, s2, a2, _ = alif_step(s1, w2, bf2, m2, s2, a2)
        m3, s3, a3, th3 = alif_step(s2, w3, bf3, m3, s3, a3)
        out_t = jnp.dot(m3, wo, preferred_element_type=jnp.float32) + bo
        rows.append(jnp.concatenate([out_t, s3, m3, th3], axis=-1))  # (N, 100)

    packed = jnp.stack(rows, axis=0)         # (T, N, PACK_W)
    pad = dense_ref.shape[-1] - packed.shape[-1]
    if pad:
        packed = jnp.concatenate(
            [packed, jnp.zeros((t_len, n, pad), jnp.float32)], axis=-1)
    dense_ref[...] = packed.reshape(t_len * n, dense_ref.shape[-1])

    # single final-state writeback: [m1 m2 m3 | s1 s2 s3 | b1 b2 b3]
    fin_ref[...] = jnp.concatenate(
        [m1, m2, m3, s1, s2, s3, a1, a2, a3], axis=-1)


# ---------------- wrapper ----------------
def srnn_alif_forward(x_ntd, params, init_state):
    """x_ntd: (N, T, in_size) float32.  Returns torch-equivalent outputs."""
    n, t, d_in = x_ntd.shape
    x_tnd = jnp.transpose(x_ntd, (1, 0, 2))  # time-major for the kernel

    (wi1, bi1, wh1, bh1, wi2, bi2, wh2, bh2,
     wi3, bi3, wh3, bh3, wo, bo) = params
    (m1, m2, m3, s1, s2, s3, a1, a2, a3) = init_state

    # one-time i2h/h2h fusion:  [x | spike] @ [[Wi],[Wh]] + (bi + bh)
    w1f = jnp.concatenate([wi1, wh1], axis=0); b1f = bi1 + bh1
    w2f = jnp.concatenate([wi2, wh2], axis=0); b2f = bi2 + bh2
    w3f = jnp.concatenate([wi3, wh3], axis=0); b3f = bi3 + bh3

    n_in = 18
    vmem_spec = pl.BlockSpec(memory_space=pltpu.MemorySpace.VMEM)

    out_shapes = (
        jax.ShapeDtypeStruct((t * n, DENSE_W), jnp.float32),   # per-step pack
        jax.ShapeDtypeStruct((n, FIN_W), jnp.float32),         # final state pack
    )

    dense, fin = pl.pallas_call(
        srnn_alif_kernel,
        out_shape=out_shapes,
        in_specs=[vmem_spec] * n_in,
        out_specs=(vmem_spec, vmem_spec),
    )(x_tnd, w1f, b1f, w2f, b2f, w3f, b3f, wo, bo,
      m1, m2, m3, s1, s2, s3, a1, a2, a3)

    # unpack lane-dense per-step buffer
    dense = dense.reshape(t, n, DENSE_W)
    outs = dense[:, :, :N_OUT]
    hs = dense[:, :, N_OUT:N_OUT + H3]
    hm = dense[:, :, N_OUT + H3:N_OUT + 2 * H3]
    ht = dense[:, :, N_OUT + 2 * H3:N_OUT + 3 * H3]

    # (T, N, ·) -> (N, T, ·), same as outputs.permute(1, 0, 2)
    output = jnp.transpose(outs, (1, 0, 2))
    hidden_spike = jnp.transpose(hs, (1, 0, 2))
    hidden_mem = jnp.transpose(hm, (1, 0, 2))
    hidden_theta = jnp.transpose(ht, (1, 0, 2))

    # unpack final state [m1 m2 m3 | s1 s2 s3 | b1 b2 b3]
    widths = [H1, H2, H3, H1, H2, H3, H1, H2, H3]
    offs = np.concatenate([[0], np.cumsum(widths)])
    parts = [fin[:, int(offs[i]):int(offs[i + 1])] for i in range(9)]
    fm1, fm2, fm3, fs1, fs2, fs3, fb1, fb2, fb3 = parts

    # fire_rate: nonzero count of final-step spikes over total neuron count
    # (matches the PyTorch module: computed from the last-step spikes only)
    n_nonzeros = (jnp.count_nonzero(fs1) + jnp.count_nonzero(fs2)
                  + jnp.count_nonzero(fs3))
    n_neurons = fs1.size + fs2.size + fs3.size
    fire_rate = (n_nonzeros / n_neurons).astype(jnp.float32)

    final_state = {
        "mem_list": [fm1, fm2, fm3],
        "spike_list": [fs1, fs2, fs3],
        "b_list": [fb1, fb2, fb3],
    }
    return output, final_state, fire_rate, hidden_spike, hidden_mem, hidden_theta


# ---------------- deterministic parameter / input construction ----------------
def make_params(key):
    ks = jax.random.split(key, 7)
    ortho = jax.nn.initializers.orthogonal()
    glorot = jax.nn.initializers.glorot_uniform()
    # torch Linear stores weight as (out, in); init on that shape, then transpose
    wi1 = glorot(ks[0], (H1, IN_SIZE), jnp.float32).T
    wi2 = glorot(ks[1], (H2, H1), jnp.float32).T
    wi3 = glorot(ks[2], (H3, H2), jnp.float32).T
    wo = glorot(ks[3], (N_OUT, H3), jnp.float32).T
    wh1 = ortho(ks[4], (H1, H1), jnp.float32).T
    wh2 = ortho(ks[5], (H2, H2), jnp.float32).T
    wh3 = ortho(ks[6], (H3, H3), jnp.float32).T
    zeros = lambda h: jnp.zeros((1, h), jnp.float32)
    # i2h/h2h biases init to 0; h2o bias left at 0 here as well
    return (wi1, zeros(H1), wh1, zeros(H1),
            wi2, zeros(H2), wh2, zeros(H2),
            wi3, zeros(H3), wh3, zeros(H3),
            wo, zeros(N_OUT))


def make_init_state(batch):
    z = lambda h: jnp.zeros((batch, h), jnp.float32)
    b = lambda h: jnp.full((batch, h), B_J0, jnp.float32)  # scalar b_j0, broadcast-equivalent
    return (z(H1), z(H2), z(H3), z(H1), z(H2), z(H3), b(H1), b(H2), b(H3))


# ---------------- pure-JAX reference (for verification, unfused weights) ----------------
def ref_forward(x_ntd, params, init_state):
    (wi1, bi1, wh1, bh1, wi2, bi2, wh2, bh2,
     wi3, bi3, wh3, bh3, wo, bo) = params
    x_tnd = jnp.transpose(x_ntd, (1, 0, 2))

    def layer(inp, wi, bi, wh, bh, m, s, b):
        h = inp @ wi + bi + s @ wh + bh
        bn = RO * b + (1.0 - RO) * s
        th = B_J0 + BETA * bn
        mn = m * ALPHA + (1.0 - ALPHA) * h - th * s
        sn = (mn - th > 0.0).astype(jnp.float32)
        return mn, sn, bn, th

    def step(carry, x_t):
        m1, m2, m3, s1, s2, s3, b1, b2, b3 = carry
        m1, s1, b1, _ = layer(x_t, wi1, bi1, wh1, bh1, m1, s1, b1)
        m2, s2, b2, _ = layer(s1, wi2, bi2, wh2, bh2, m2, s2, b2)
        m3, s3, b3, th3 = layer(s2, wi3, bi3, wh3, bh3, m3, s3, b3)
        out = m3 @ wo + bo
        return (m1, m2, m3, s1, s2, s3, b1, b2, b3), (out, s3, m3, th3)

    carry, (outs, hs, hm, ht) = lax.scan(step, init_state, x_tnd)
    return (jnp.transpose(outs, (1, 0, 2)), carry,
            jnp.transpose(hs, (1, 0, 2)), jnp.transpose(hm, (1, 0, 2)),
            jnp.transpose(ht, (1, 0, 2)))


if __name__ == "__main__":
    key = jax.random.PRNGKey(0)
    k_x, k_p = jax.random.split(key)
    x = jax.random.normal(k_x, (N, T, IN_SIZE), jnp.float32)
    params = make_params(k_p)
    init_state = make_init_state(N)

    out = srnn_alif_forward(x, params, init_state)
    out = jax.block_until_ready(out)
    output, final_state, fire_rate, hidden_spike, hidden_mem, hidden_theta = out

    # verify against pure-JAX reference
    r_out, r_carry, r_hs, r_hm, r_ht = ref_forward(x, params, init_state)
    np.testing.assert_allclose(np.asarray(output), np.asarray(r_out), rtol=1e-5, atol=1e-5)
    np.testing.assert_allclose(np.asarray(hidden_spike), np.asarray(r_hs), rtol=1e-5, atol=1e-5)
    np.testing.assert_allclose(np.asarray(hidden_mem), np.asarray(r_hm), rtol=1e-5, atol=1e-5)
    np.testing.assert_allclose(np.asarray(hidden_theta), np.asarray(r_ht), rtol=1e-5, atol=1e-5)
    ref_finals = list(r_carry)  # (m1, m2, m3, s1, s2, s3, b1, b2, b3)
    ker_finals = (final_state["mem_list"] + final_state["spike_list"]
                  + final_state["b_list"])
    for kf, rf in zip(ker_finals, ref_finals):
        np.testing.assert_allclose(np.asarray(kf), np.asarray(rf), rtol=1e-5, atol=1e-5)

    print("KERNEL_OK")
</pallas_src>

<mosaic_0001>
module attributes {stable_mosaic.version = 11 : i64} {
  func.func @srnn_alif_kernel(%arg0: memref<8x2x16xf32, #tpu.memory_space<vmem>>, %arg1: memref<48x32xf32, #tpu.memory_space<vmem>>, %arg2: memref<1x32xf32, #tpu.memory_space<vmem>>, %arg3: memref<64x32xf32, #tpu.memory_space<vmem>>, %arg4: memref<1x32xf32, #tpu.memory_space<vmem>>, %arg5: memref<64x32xf32, #tpu.memory_space<vmem>>, %arg6: memref<1x32xf32, #tpu.memory_space<vmem>>, %arg7: memref<32x4xf32, #tpu.memory_space<vmem>>, %arg8: memref<1x4xf32, #tpu.memory_space<vmem>>, %arg9: memref<2x32xf32, #tpu.memory_space<vmem>>, %arg10: memref<2x32xf32, #tpu.memory_space<vmem>>, %arg11: memref<2x32xf32, #tpu.memory_space<vmem>>, %arg12: memref<2x32xf32, #tpu.memory_space<vmem>>, %arg13: memref<2x32xf32, #tpu.memory_space<vmem>>, %arg14: memref<2x32xf32, #tpu.memory_space<vmem>>, %arg15: memref<2x32xf32, #tpu.memory_space<vmem>>, %arg16: memref<2x32xf32, #tpu.memory_space<vmem>>, %arg17: memref<2x32xf32, #tpu.memory_space<vmem>>, %arg18: memref<16x128xf32, #tpu.memory_space<vmem>>, %arg19: memref<2x288xf32, #tpu.memory_space<vmem>>) attributes {dimension_semantics = [], scalar_prefetch = 0 : i64, scratch_operands = 0 : i64, tpu.core_type = #tpu.core_type<tc>} {
    %c0 = arith.constant 0 : index
    %c0_0 = arith.constant 0 : index
    %c0_1 = arith.constant 0 : index
    %0 = vector.load %arg0[%c0, %c0_0, %c0_1] : memref<8x2x16xf32, #tpu.memory_space<vmem>>, vector<8x2x16xf32>
    %c0_2 = arith.constant 0 : index
    %c0_3 = arith.constant 0 : index
    %1 = vector.load %arg1[%c0_2, %c0_3] : memref<48x32xf32, #tpu.memory_space<vmem>>, vector<48x32xf32>
    %c0_4 = arith.constant 0 : index
    %c0_5 = arith.constant 0 : index
    %2 = vector.load %arg2[%c0_4, %c0_5] : memref<1x32xf32, #tpu.memory_space<vmem>>, vector<1x32xf32>
    %c0_6 = arith.constant 0 : index
    %c0_7 = arith.constant 0 : index
    %3 = vector.load %arg3[%c0_6, %c0_7] : memref<64x32xf32, #tpu.memory_space<vmem>>, vector<64x32xf32>
    %c0_8 = arith.constant 0 : index
    %c0_9 = arith.constant 0 : index
    %4 = vector.load %arg4[%c0_8, %c0_9] : memref<1x32xf32, #tpu.memory_space<vmem>>, vector<1x32xf32>
    %c0_10 = arith.constant 0 : index
    %c0_11 = arith.constant 0 : index
    %5 = vector.load %arg5[%c0_10, %c0_11] : memref<64x32xf32, #tpu.memory_space<vmem>>, vector<64x32xf32>
    %c0_12 = arith.constant 0 : index
    %c0_13 = arith.constant 0 : index
    %6 = vector.load %arg6[%c0_12, %c0_13] : memref<1x32xf32, #tpu.memory_space<vmem>>, vector<1x32xf32>
    %c0_14 = arith.constant 0 : index
    %c0_15 = arith.constant 0 : index
    %7 = vector.load %arg7[%c0_14, %c0_15] : memref<32x4xf32, #tpu.memory_space<vmem>>, vector<32x4xf32>
    %c0_16 = arith.constant 0 : index
    %c0_17 = arith.constant 0 : index
    %8 = vector.load %arg8[%c0_16, %c0_17] : memref<1x4xf32, #tpu.memory_space<vmem>>, vector<1x4xf32>
    %c0_18 = arith.constant 0 : index
    %c0_19 = arith.constant 0 : index
    %9 = vector.load %arg9[%c0_18, %c0_19] : memref<2x32xf32, #tpu.memory_space<vmem>>, vector<2x32xf32>
    %c0_20 = arith.constant 0 : index
    %c0_21 = arith.constant 0 : index
    %10 = vector.load %arg10[%c0_20, %c0_21] : memref<2x32xf32, #tpu.memory_space<vmem>>, vector<2x32xf32>
    %c0_22 = arith.constant 0 : index
    %c0_23 = arith.constant 0 : index
    %11 = vector.load %arg11[%c0_22, %c0_23] : memref<2x32xf32, #tpu.memory_space<vmem>>, vector<2x32xf32>
    %c0_24 = arith.constant 0 : index
    %c0_25 = arith.constant 0 : index
    %12 = vector.load %arg12[%c0_24, %c0_25] : memref<2x32xf32, #tpu.memory_space<vmem>>, vector<2x32xf32>
    %c0_26 = arith.constant 0 : index
    %c0_27 = arith.constant 0 : index
    %13 = vector.load %arg13[%c0_26, %c0_27] : memref<2x32xf32, #tpu.memory_space<vmem>>, vector<2x32xf32>
    %c0_28 = arith.constant 0 : index
    %c0_29 = arith.constant 0 : index
    %14 = vector.load %arg14[%c0_28, %c0_29] : memref<2x32xf32, #tpu.memory_space<vmem>>, vector<2x32xf32>
    %c0_30 = arith.constant 0 : index
    %c0_31 = arith.constant 0 : index
    %15 = vector.load %arg15[%c0_30, %c0_31] : memref<2x32xf32, #tpu.memory_space<vmem>>, vector<2x32xf32>
    %c0_32 = arith.constant 0 : index
    %c0_33 = arith.constant 0 : index
    %16 = vector.load %arg16[%c0_32, %c0_33] : memref<2x32xf32, #tpu.memory_space<vmem>>, vector<2x32xf32>
    %c0_34 = arith.constant 0 : index
    %c0_35 = arith.constant 0 : index
    %17 = vector.load %arg17[%c0_34, %c0_35] : memref<2x32xf32, #tpu.memory_space<vmem>>, vector<2x32xf32>
    %18 = vector.extract_strided_slice %0 {offsets = [0, 0, 0], sizes = [1, 2, 16], strides = [1, 1, 1]} : vector<8x2x16xf32> to vector<1x2x16xf32>
    %19 = vector.shape_cast %18 : vector<1x2x16xf32> to vector<2x16xf32>
    %20 = tpu.concatenate %19, %12 in 1 : vector<2x16xf32>, vector<2x32xf32> -> vector<2x48xf32>
    %cst = arith.constant dense<0.000000e+00> : vector<2x32xf32>
    %21 = tpu.matmul %20, %1, %cst {dimension_numbers = #tpu.dot_dimension_numbers<[1], [0], [0], [1], [0, 0, 1, 1], [], []>} : vector<2x48xf32>, vector<48x32xf32>, vector<2x32xf32> -> vector<2x32xf32>
    %22 = vector.broadcast %2 : vector<1x32xf32> to vector<2x32xf32>
    %23 = arith.addf %21, %22 : vector<2x32xf32>
    %cst_36 = arith.constant 0.998334705 : f32
    %24 = vector.broadcast %cst_36 : f32 to vector<2x32xf32>
    %25 = arith.mulf %24, %15 : vector<2x32xf32>
    %cst_37 = arith.constant 0.00166527857 : f32
    %26 = vector.broadcast %cst_37 : f32 to vector<2x32xf32>
    %27 = arith.mulf %26, %12 : vector<2x32xf32>
    %28 = arith.addf %25, %27 : vector<2x32xf32>
    %cst_38 = arith.constant 1.800000e+00 : f32
    %29 = vector.broadcast %cst_38 : f32 to vector<2x32xf32>
    %30 = arith.mulf %29, %28 : vector<2x32xf32>
    %cst_39 = arith.constant 0.00999999977 : f32
    %31 = vector.broadcast %cst_39 : f32 to vector<2x32xf32>
    %32 = arith.addf %31, %30 : vector<2x32xf32>
    %cst_40 = arith.constant 0.951229453 : f32
    %33 = vector.broadcast %cst_40 : f32 to vector<2x32xf32>
    %34 = arith.mulf %9, %33 : vector<2x32xf32>
    %cst_41 = arith.constant 0.0487705767 : f32
    %35 = vector.broadcast %cst_41 : f32 to vector<2x32xf32>
    %36 = arith.mulf %35, %23 : vector<2x32xf32>
    %37 = arith.addf %34, %36 : vector<2x32xf32>
    %38 = arith.mulf %32, %12 : vector<2x32xf32>
    %cst_42 = arith.constant 1.000000e+00 : f32
    %39 = vector.broadcast %cst_42 : f32 to vector<2x32xf32>
    %40 = arith.mulf %38, %39 : vector<2x32xf32>
    %41 = arith.subf %37, %40 : vector<2x32xf32>
    %42 = arith.subf %41, %32 : vector<2x32xf32>
    %cst_43 = arith.constant 0.000000e+00 : f32
    %43 = vector.broadcast %cst_43 : f32 to vector<2x32xf32>
    %44 = arith.cmpf ogt, %42, %43 : vector<2x32xf32>
    %45 = arith.extui %44 : vector<2x32xi1> to vector<2x32xi32>
    %46 = arith.sitofp %45 : vector<2x32xi32> to vector<2x32xf32>
    %47 = tpu.concatenate %46, %13 in 1 : vector<2x32xf32>, vector<2x32xf32> -> vector<2x64xf32>
    %cst_44 = arith.constant dense<0.000000e+00> : vector<2x32xf32>
    %48 = tpu.matmul %47, %3, %cst_44 {dimension_numbers = #tpu.dot_dimension_numbers<[1], [0], [0], [1], [0, 0, 1, 1], [], []>} : vector<2x64xf32>, vector<64x32xf32>, vector<2x32xf32> -> vector<2x32xf32>
    %49 = vector.broadcast %4 : vector<1x32xf32> to vector<2x32xf32>
    %50 = arith.addf %48, %49 : vector<2x32xf32>
    %cst_45 = arith.constant 0.998334705 : f32
    %51 = vector.broadcast %cst_45 : f32 to vector<2x32xf32>
    %52 = arith.mulf %51, %16 : vector<2x32xf32>
    %cst_46 = arith.constant 0.00166527857 : f32
    %53 = vector.broadcast %cst_46 : f32 to vector<2x32xf32>
    %54 = arith.mulf %53, %13 : vector<2x32xf32>
    %55 = arith.addf %52, %54 : vector<2x32xf32>
    %cst_47 = arith.constant 1.800000e+00 : f32
    %56 = vector.broadcast %cst_47 : f32 to vector<2x32xf32>
    %57 = arith.mulf %56, %55 : vector<2x32xf32>
    %cst_48 = arith.constant 0.00999999977 : f32
    %58 = vector.broadcast %cst_48 : f32 to vector<2x32xf32>
    %59 = arith.addf %58, %57 : vector<2x32xf32>
    %cst_49 = arith.constant 0.951229453 : f32
    %60 = vector.broadcast %cst_49 : f32 to vector<2x32xf32>
    %61 = arith.mulf %10, %60 : vector<2x32xf32>
    %cst_50 = arith.constant 0.0487705767 : f32
    %62 = vector.broadcast %cst_50 : f32 to vector<2x32xf32>
    %63 = arith.mulf %62, %50 : vector<2x32xf32>
    %64 = arith.addf %61, %63 : vector<2x32xf32>
    %65 = arith.mulf %59, %13 : vector<2x32xf32>
    %cst_51 = arith.constant 1.000000e+00 : f32
    %66 = vector.broadcast %cst_51 : f32 to vector<2x32xf32>
    %67 = arith.mulf %65, %66 : vector<2x32xf32>
    %68 = arith.subf %64, %67 : vector<2x32xf32>
    %69 = arith.subf %68, %59 : vector<2x32xf32>
    %cst_52 = arith.constant 0.000000e+00 : f32
    %70 = vector.broadcast %cst_52 : f32 to vector<2x32xf32>
    %71 = arith.cmpf ogt, %69, %70 : vector<2x32xf32>
    %72 = arith.extui %71 : vector<2x32xi1> to vector<2x32xi32>
    %73 = arith.sitofp %72 : vector<2x32xi32> to vector<2x32xf32>
    %74 = tpu.concatenate %73, %14 in 1 : vector<2x32xf32>, vector<2x32xf32> -> vector<2x64xf32>
    %cst_53 = arith.constant dense<0.000000e+00> : vector<2x32xf32>
    %75 = tpu.matmul %74, %5, %cst_53 {dimension_numbers = #tpu.dot_dimension_numbers<[1], [0], [0], [1], [0, 0, 1, 1], [], []>} : vector<2x64xf32>, vector<64x32xf32>, vector<2x32xf32> -> vector<2x32xf32>
    %76 = vector.broadcast %6 : vector<1x32xf32> to vector<2x32xf32>
    %77 = arith.addf %75, %76 : vector<2x32xf32>
    %cst_54 = arith.constant 0.998334705 : f32
    %78 = vector.broadcast %cst_54 : f32 to vector<2x32xf32>
    %79 = arith.mulf %78, %17 : vector<2x32xf32>
    %cst_55 = arith.constant 0.00166527857 : f32
    %80 = vector.broadcast %cst_55 : f32 to vector<2x32xf32>
    %81 = arith.mulf %80, %14 : vector<2x32xf32>
    %82 = arith.addf %79, %81 : vector<2x32xf32>
    %cst_56 = arith.constant 1.800000e+00 : f32
    %83 = vector.broadcast %cst_56 : f32 to vector<2x32xf32>
    %84 = arith.mulf %83, %82 : vector<2x32xf32>
    %cst_57 = arith.constant 0.00999999977 : f32
    %85 = vector.broadcast %cst_57 : f32 to vector<2x32xf32>
    %86 = arith.addf %85, %84 : vector<2x32xf32>
    %cst_58 = arith.constant 0.951229453 : f32
    %87 = vector.broadcast %cst_58 : f32 to vector<2x32xf32>
    %88 = arith.mulf %11, %87 : vector<2x32xf32>
    %cst_59 = arith.constant 0.0487705767 : f32
    %89 = vector.broadcast %cst_59 : f32 to vector<2x32xf32>
    %90 = arith.mulf %89, %77 : vector<2x32xf32>
    %91 = arith.addf %88, %90 : vector<2x32xf32>
    %92 = arith.mulf %86, %14 : vector<2x32xf32>
    %cst_60 = arith.constant 1.000000e+00 : f32
    %93 = vector.broadcast %cst_60 : f32 to vector<2x32xf32>
    %94 = arith.mulf %92, %93 : vector<2x32xf32>
    %95 = arith.subf %91, %94 : vector<2x32xf32>
    %96 = arith.subf %95, %86 : vector<2x32xf32>
    %cst_61 = arith.constant 0.000000e+00 : f32
    %97 = vector.broadcast %cst_61 : f32 to vector<2x32xf32>
    %98 = arith.cmpf ogt, %96, %97 : vector<2x32xf32>
    %99 = arith.extui %98 : vector<2x32xi1> to vector<2x32xi32>
    %100 = arith.sitofp %99 : vector<2x32xi32> to vector<2x32xf32>
    %cst_62 = arith.constant dense<0.000000e+00> : vector<2x4xf32>
    %101 = tpu.matmul %95, %7, %cst_62 {dimension_numbers = #tpu.dot_dimension_numbers<[1], [0], [0], [1], [0, 0, 1, 1], [], []>} : vector<2x32xf32>, vector<32x4xf32>, vector<2x4xf32> -> vector<2x4xf32>
    %102 = vector.broadcast %8 : vector<1x4xf32> to vector<2x4xf32>
    %103 = arith.addf %101, %102 : vector<2x4xf32>
    %104 = tpu.concatenate %103, %100, %95, %86 in 1 : vector<2x4xf32>, vector<2x32xf32>, vector<2x32xf32>, vector<2x32xf32> -> vector<2x100xf32>
    %105 = vector.extract_strided_slice %0 {offsets = [1, 0, 0], sizes = [1, 2, 16], strides = [1, 1, 1]} : vector<8x2x16xf32> to vector<1x2x16xf32>
    %106 = vector.shape_cast %105 : vector<1x2x16xf32> to vector<2x16xf32>
    %107 = tpu.concatenate %106, %46 in 1 : vector<2x16xf32>, vector<2x32xf32> -> vector<2x48xf32>
    %cst_63 = arith.constant dense<0.000000e+00> : vector<2x32xf32>
    %108 = tpu.matmul %107, %1, %cst_63 {dimension_numbers = #tpu.dot_dimension_numbers<[1], [0], [0], [1], [0, 0, 1, 1], [], []>} : vector<2x48xf32>, vector<48x32xf32>, vector<2x32xf32> -> vector<2x32xf32>
    %109 = vector.broadcast %2 : vector<1x32xf32> to vector<2x32xf32>
    %110 = arith.addf %108, %109 : vector<2x32xf32>
    %cst_64 = arith.constant 0.998334705 : f32
    %111 = vector.broadcast %cst_64 : f32 to vector<2x32xf32>
    %112 = arith.mulf %111, %28 : vector<2x32xf32>
    %cst_65 = arith.constant 0.00166527857 : f32
    %113 = vector.broadcast %cst_65 : f32 to vector<2x32xf32>
    %114 = arith.mulf %113, %46 : vector<2x32xf32>
    %115 = arith.addf %112, %114 : vector<2x32xf32>
    %cst_66 = arith.constant 1.800000e+00 : f32
    %116 = vector.broadcast %cst_66 : f32 to vector<2x32xf32>
    %117 = arith.mulf %116, %115 : vector<2x32xf32>
    %cst_67 = arith.constant 0.00999999977 : f32
    %118 = vector.broadcast %cst_67 : f32 to vector<2x32xf32>
    %119 = arith.addf %118, %117 : vector<2x32xf32>
    %cst_68 = arith.constant 0.951229453 : f32
    %120 = vector.broadcast %cst_68 : f32 to vector<2x32xf32>
    %121 = arith.mulf %41, %120 : vector<2x32xf32>
    %cst_69 = arith.constant 0.0487705767 : f32
    %122 = vector.broadcast %cst_69 : f32 to vector<2x32xf32>
    %123 = arith.mulf %122, %110 : vector<2x32xf32>
    %124 = arith.addf %121, %123 : vector<2x32xf32>
    %125 = arith.mulf %119, %46 : vector<2x32xf32>
    %cst_70 = arith.constant 1.000000e+00 : f32
    %126 = vector.broadcast %cst_70 : f32 to vector<2x32xf32>
    %127 = arith.mulf %125, %126 : vector<2x32xf32>
    %128 = arith.subf %124, %127 : vector<2x32xf32>
    %129 = arith.subf %128, %119 : vector<2x32xf32>
    %cst_71 = arith.constant 0.000000e+00 : f32
    %130 = vector.broadcast %cst_71 : f32 to vector<2x32xf32>
    %131 = arith.cmpf ogt, %129, %130 : vector<2x32xf32>
    %132 = arith.extui %131 : vector<2x32xi1> to vector<2x32xi32>
    %133 = arith.sitofp %132 : vector<2x32xi32> to vector<2x32xf32>
    %134 = tpu.concatenate %133, %73 in 1 : vector<2x32xf32>, vector<2x32xf32> -> vector<2x64xf32>
    %cst_72 = arith.constant dense<0.000000e+00> : vector<2x32xf32>
    %135 = tpu.matmul %134, %3, %cst_72 {dimension_numbers = #tpu.dot_dimension_numbers<[1], [0], [0], [1], [0, 0, 1, 1], [], []>} : vector<2x64xf32>, vector<64x32xf32>, vector<2x32xf32> -> vector<2x32xf32>
    %136 = vector.broadcast %4 : vector<1x32xf32> to vector<2x32xf32>
    %137 = arith.addf %135, %136 : vector<2x32xf32>
    %cst_73 = arith.constant 0.998334705 : f32
    %138 = vector.broadcast %cst_73 : f32 to vector<2x32xf32>
    %139 = arith.mulf %138, %55 : vector<2x32xf32>
    %cst_74 = arith.constant 0.00166527857 : f32
    %140 = vector.broadcast %cst_74 : f32 to vector<2x32xf32>
    %141 = arith.mulf %140, %73 : vector<2x32xf32>
    %142 = arith.addf %139, %141 : vector<2x32xf32>
    %cst_75 = arith.constant 1.800000e+00 : f32
    %143 = vector.broadcast %cst_75 : f32 to vector<2x32xf32>
    %144 = arith.mulf %143, %142 : vector<2x32xf32>
    %cst_76 = arith.constant 0.00999999977 : f32
    %145 = vector.broadcast %cst_76 : f32 to vector<2x32xf32>
    %146 = arith.addf %145, %144 : vector<2x32xf32>
    %cst_77 = arith.constant 0.951229453 : f32
    %147 = vector.broadcast %cst_77 : f32 to vector<2x32xf32>
    %148 = arith.mulf %68, %147 : vector<2x32xf32>
    %cst_78 = arith.constant 0.0487705767 : f32
    %149 = vector.broadcast %cst_78 : f32 to vector<2x32xf32>
    %150 = arith.mulf %149, %137 : vector<2x32xf32>
    %151 = arith.addf %148, %150 : vector<2x32xf32>
    %152 = arith.mulf %146, %73 : vector<2x32xf32>
    %cst_79 = arith.constant 1.000000e+00 : f32
    %153 = vector.broadcast %cst_79 : f32 to vector<2x32xf32>
    %154 = arith.mulf %152, %153 : vector<2x32xf32>
    %155 = arith.subf %151, %154 : vector<2x32xf32>
    %156 = arith.subf %155, %146 : vector<2x32xf32>
    %cst_80 = arith.constant 0.000000e+00 : f32
    %157 = vector.broadcast %cst_80 : f32 to vector<2x32xf32>
    %158 = arith.cmpf ogt, %156, %157 : vector<2x32xf32>
    %159 = arith.extui %158 : vector<2x32xi1> to vector<2x32xi32>
    %160 = arith.sitofp %159 : vector<2x32xi32> to vector<2x32xf32>
    %161 = tpu.concatenate %160, %100 in 1 : vector<2x32xf32>, vector<2x32xf32> -> vector<2x64xf32>
    %cst_81 = arith.constant dense<0.000000e+00> : vector<2x32xf32>
    %162 = tpu.matmul %161, %5, %cst_81 {dimension_numbers = #tpu.dot_dimension_numbers<[1], [0], [0], [1], [0, 0, 1, 1], [], []>} : vector<2x64xf32>, vector<64x32xf32>, vector<2x32xf32> -> vector<2x32xf32>
    %163 = vector.broadcast %6 : vector<1x32xf32> to vector<2x32xf32>
    %164 = arith.addf %162, %163 : vector<2x32xf32>
    %cst_82 = arith.constant 0.998334705 : f32
    %165 = vector.broadcast %cst_82 : f32 to vector<2x32xf32>
    %166 = arith.mulf %165, %82 : vector<2x32xf32>
    %cst_83 = arith.constant 0.00166527857 : f32
    %167 = vector.broadcast %cst_83 : f32 to vector<2x32xf32>
    %168 = arith.mulf %167, %100 : vector<2x32xf32>
    %169 = arith.addf %166, %168 : vector<2x32xf32>
    %cst_84 = arith.constant 1.800000e+00 : f32
    %170 = vector.broadcast %cst_84 : f32 to vector<2x32xf32>
    %171 = arith.mulf %170, %169 : vector<2x32xf32>
    %cst_85 = arith.constant 0.00999999977 : f32
    %172 = vector.broadcast %cst_85 : f32 to vector<2x32xf32>
    %173 = arith.addf %172, %171 : vector<2x32xf32>
    %cst_86 = arith.constant 0.951229453 : f32
    %174 = vector.broadcast %cst_86 : f32 to vector<2x32xf32>
    %175 = arith.mulf %95, %174 : vector<2x32xf32>
    %cst_87 = arith.constant 0.0487705767 : f32
    %176 = vector.broadcast %cst_87 : f32 to vector<2x32xf32>
    %177 = arith.mulf %176, %164 : vector<2x32xf32>
    %178 = arith.addf %175, %177 : vector<2x32xf32>
    %179 = arith.mulf %173, %100 : vector<2x32xf32>
    %cst_88 = arith.constant 1.000000e+00 : f32
    %180 = vector.broadcast %cst_88 : f32 to vector<2x32xf32>
    %181 = arith.mulf %179, %180 : vector<2x32xf32>
    %182 = arith.subf %178, %181 : vector<2x32xf32>
    %183 = arith.subf %182, %173 : vector<2x32xf32>
    %cst_89 = arith.constant 0.000000e+00 : f32
    %184 = vector.broadcast %cst_89 : f32 to vector<2x32xf32>
    %185 = arith.cmpf ogt, %183, %184 : vector<2x32xf32>
    %186 = arith.extui %185 : vector<2x32xi1> to vector<2x32xi32>
    %187 = arith.sitofp %186 : vector<2x32xi32> to vector<2x32xf32>
    %cst_90 = arith.constant dense<0.000000e+00> : vector<2x4xf32>
    %188 = tpu.matmul %182, %7, %cst_90 {dimension_numbers = #tpu.dot_dimension_numbers<[1], [0], [0], [1], [0, 0, 1, 1], [], []>} : vector<2x32xf32>, vector<32x4xf32>, vector<2x4xf32> -> vector<2x4xf32>
    %189 = vector.broadcast %8 : vector<1x4xf32> to vector<2x4xf32>
    %190 = arith.addf %188, %189 : vector<2x4xf32>
    %191 = tpu.concatenate %190, %187, %182, %173 in 1 : vector<2x4xf32>, vector<2x32xf32>, vector<2x32xf32>, vector<2x32xf32> -> vector<2x100xf32>
    %192 = vector.extract_strided_slice %0 {offsets = [2, 0, 0], sizes = [1, 2, 16], strides = [1, 1, 1]} : vector<8x2x16xf32> to vector<1x2x16xf32>
    %193 = vector.shape_cast %192 : vector<1x2x16xf32> to vector<2x16xf32>
    %194 = tpu.concatenate %193, %133 in 1 : vector<2x16xf32>, vector<2x32xf32> -> vector<2x48xf32>
    %cst_91 = arith.constant dense<0.000000e+00> : vector<2x32xf32>
    %195 = tpu.matmul %194, %1, %cst_91 {dimension_numbers = #tpu.dot_dimension_numbers<[1], [0], [0], [1], [0, 0, 1, 1], [], []>} : vector<2x48xf32>, vector<48x32xf32>, vector<2x32xf32> -> vector<2x32xf32>
    %196 = vector.broadcast %2 : vector<1x32xf32> to vector<2x32xf32>
    %197 = arith.addf %195, %196 : vector<2x32xf32>
    %cst_92 = arith.constant 0.998334705 : f32
    %198 = vector.broadcast %cst_92 : f32 to vector<2x32xf32>
    %199 = arith.mulf %198, %115 : vector<2x32xf32>
    %cst_93 = arith.constant 0.00166527857 : f32
    %200 = vector.broadcast %cst_93 : f32 to vector<2x32xf32>
    %201 = arith.mulf %200, %133 : vector<2x32xf32>
    %202 = arith.addf %199, %201 : vector<2x32xf32>
    %cst_94 = arith.constant 1.800000e+00 : f32
    %203 = vector.broadcast %cst_94 : f32 to vector<2x32xf32>
    %204 = arith.mulf %203, %202 : vector<2x32xf32>
    %cst_95 = arith.constant 0.00999999977 : f32
    %205 = vector.broadcast %cst_95 : f32 to vector<2x32xf32>
    %206 = arith.addf %205, %204 : vector<2x32xf32>
    %cst_96 = arith.constant 0.951229453 : f32
    %207 = vector.broadcast %cst_96 : f32 to vector<2x32xf32>
    %208 = arith.mulf %128, %207 : vector<2x32xf32>
    %cst_97 = arith.constant 0.0487705767 : f32
    %209 = vector.broadcast %cst_97 : f32 to vector<2x32xf32>
    %210 = arith.mulf %209, %197 : vector<2x32xf32>
    %211 = arith.addf %208, %210 : vector<2x32xf32>
    %212 = arith.mulf %206, %133 : vector<2x32xf32>
    %cst_98 = arith.constant 1.000000e+00 : f32
    %213 = vector.broadcast %cst_98 : f32 to vector<2x32xf32>
    %214 = arith.mulf %212, %213 : vector<2x32xf32>
    %215 = arith.subf %211, %214 : vector<2x32xf32>
    %216 = arith.subf %215, %206 : vector<2x32xf32>
    %cst_99 = arith.constant 0.000000e+00 : f32
    %217 = vector.broadcast %cst_99 : f32 to vector<2x32xf32>
    %218 = arith.cmpf ogt, %216, %217 : vector<2x32xf32>
    %219 = arith.extui %218 : vector<2x32xi1> to vector<2x32xi32>
    %220 = arith.sitofp %219 : vector<2x32xi32> to vector<2x32xf32>
    %221 = tpu.concatenate %220, %160 in 1 : vector<2x32xf32>, vector<2x32xf32> -> vector<2x64xf32>
    %cst_100 = arith.constant dense<0.000000e+00> : vector<2x32xf32>
    %222 = tpu.matmul %221, %3, %cst_100 {dimension_numbers = #tpu.dot_dimension_numbers<[1], [0], [0], [1], [0, 0, 1, 1], [], []>} : vector<2x64xf32>, vector<64x32xf32>, vector<2x32xf32> -> vector<2x32xf32>
    %223 = vector.broadcast %4 : vector<1x32xf32> to vector<2x32xf32>
    %224 = arith.addf %222, %223 : vector<2x32xf32>
    %cst_101 = arith.constant 0.998334705 : f32
    %225 = vector.broadcast %cst_101 : f32 to vector<2x32xf32>
    %226 = arith.mulf %225, %142 : vector<2x32xf32>
    %cst_102 = arith.constant 0.00166527857 : f32
    %227 = vector.broadcast %cst_102 : f32 to vector<2x32xf32>
    %228 = arith.mulf %227, %160 : vector<2x32xf32>
    %229 = arith.addf %226, %228 : vector<2x32xf32>
    %cst_103 = arith.constant 1.800000e+00 : f32
    %230 = vector.broadcast %cst_103 : f32 to vector<2x32xf32>
    %231 = arith.mulf %230, %229 : vector<2x32xf32>
    %cst_104 = arith.constant 0.00999999977 : f32
    %232 = vector.broadcast %cst_104 : f32 to vector<2x32xf32>
    %233 = arith.addf %232, %231 : vector<2x32xf32>
    %cst_105 = arith.constant 0.951229453 : f32
    %234 = vector.broadcast %cst_105 : f32 to vector<2x32xf32>
    %235 = arith.mulf %155, %234 : vector<2x32xf32>
    %cst_106 = arith.constant 0.0487705767 : f32
    %236 = vector.broadcast %cst_106 : f32 to vector<2x32xf32>
    %237 = arith.mulf %236, %224 : vector<2x32xf32>
    %238 = arith.addf %235, %237 : vector<2x32xf32>
    %239 = arith.mulf %233, %160 : vector<2x32xf32>
    %cst_107 = arith.constant 1.000000e+00 : f32
    %240 = vector.broadcast %cst_107 : f32 to vector<2x32xf32>
    %241 = arith.mulf %239, %240 : vector<2x32xf32>
    %242 = arith.subf %238, %241 : vector<2x32xf32>
    %243 = arith.subf %242, %233 : vector<2x32xf32>
    %cst_108 = arith.constant 0.000000e+00 : f32
    %244 = vector.broadcast %cst_108 : f32 to vector<2x32xf32>
    %245 = arith.cmpf ogt, %243, %244 : vector<2x32xf32>
    %246 = arith.extui %245 : vector<2x32xi1> to vector<2x32xi32>
    %247 = arith.sitofp %246 : vector<2x32xi32> to vector<2x32xf32>
    %248 = tpu.concatenate %247, %187 in 1 : vector<2x32xf32>, vector<2x32xf32> -> vector<2x64xf32>
    %cst_109 = arith.constant dense<0.000000e+00> : vector<2x32xf32>
    %249 = tpu.matmul %248, %5, %cst_109 {dimension_numbers = #tpu.dot_dimension_numbers<[1], [0], [0], [1], [0, 0, 1, 1], [], []>} : vector<2x64xf32>, vector<64x32xf32>, vector<2x32xf32> -> vector<2x32xf32>
    %250 = vector.broadcast %6 : vector<1x32xf32> to vector<2x32xf32>
    %251 = arith.addf %249, %250 : vector<2x32xf32>
    %cst_110 = arith.constant 0.998334705 : f32
    %252 = vector.broadcast %cst_110 : f32 to vector<2x32xf32>
    %253 = arith.mulf %252, %169 : vector<2x32xf32>
    %cst_111 = arith.constant 0.00166527857 : f32
    %254 = vector.broadcast %cst_111 : f32 to vector<2x32xf32>
    %255 = arith.mulf %254, %187 : vector<2x32xf32>
    %256 = arith.addf %253, %255 : vector<2x32xf32>
    %cst_112 = arith.constant 1.800000e+00 : f32
    %257 = vector.broadcast %cst_112 : f32 to vector<2x32xf32>
    %258 = arith.mulf %257, %256 : vector<2x32xf32>
    %cst_113 = arith.constant 0.00999999977 : f32
    %259 = vector.broadcast %cst_113 : f32 to vector<2x32xf32>
    %260 = arith.addf %259, %258 : vector<2x32xf32>
    %cst_114 = arith.constant 0.951229453 : f32
    %261 = vector.broadcast %cst_114 : f32 to vector<2x32xf32>
    %262 = arith.mulf %182, %261 : vector<2x32xf32>
    %cst_115 = arith.constant 0.0487705767 : f32
    %263 = vector.broadcast %cst_115 : f32 to vector<2x32xf32>
    %264 = arith.mulf %263, %251 : vector<2x32xf32>
    %265 = arith.addf %262, %264 : vector<2x32xf32>
    %266 = arith.mulf %260, %187 : vector<2x32xf32>
    %cst_116 = arith.constant 1.000000e+00 : f32
    %267 = vector.broadcast %cst_116 : f32 to vector<2x32xf32>
    %268 = arith.mulf %266, %267 : vector<2x32xf32>
    %269 = arith.subf %265, %268 : vector<2x32xf32>
    %270 = arith.subf %269, %260 : vector<2x32xf32>
    %cst_117 = arith.constant 0.000000e+00 : f32
    %271 = vector.broadcast %cst_117 : f32 to vector<2x32xf32>
    %272 = arith.cmpf ogt, %270, %271 : vector<2x32xf32>
    %273 = arith.extui %272 : vector<2x32xi1> to vector<2x32xi32>
    %274 = arith.sitofp %273 : vector<2x32xi32> to vector<2x32xf32>
    %cst_118 = arith.constant dense<0.000000e+00> : vector<2x4xf32>
    %275 = tpu.matmul %269, %7, %cst_118 {dimension_numbers = #tpu.dot_dimension_numbers<[1], [0], [0], [1], [0, 0, 1, 1], [], []>} : vector<2x32xf32>, vector<32x4xf32>, vector<2x4xf32> -> vector<2x4xf32>
    %276 = vector.broadcast %8 : vector<1x4xf32> to vector<2x4xf32>
    %277 = arith.addf %275, %276 : vector<2x4xf32>
    %278 = tpu.concatenate %277, %274, %269, %260 in 1 : vector<2x4xf32>, vector<2x32xf32>, vector<2x32xf32>, vector<2x32xf32> -> vector<2x100xf32>
    %279 = vector.extract_strided_slice %0 {offsets = [3, 0, 0], sizes = [1, 2, 16], strides = [1, 1, 1]} : vector<8x2x16xf32> to vector<1x2x16xf32>
    %280 = vector.shape_cast %279 : vector<1x2x16xf32> to vector<2x16xf32>
    %281 = tpu.concatenate %280, %220 in 1 : vector<2x16xf32>, vector<2x32xf32> -> vector<2x48xf32>
    %cst_119 = arith.constant dense<0.000000e+00> : vector<2x32xf32>
    %282 = tpu.matmul %281, %1, %cst_119 {dimension_numbers = #tpu.dot_dimension_numbers<[1], [0], [0], [1], [0, 0, 1, 1], [], []>} : vector<2x48xf32>, vector<48x32xf32>, vector<2x32xf32> -> vector<2x32xf32>
    %283 = vector.broadcast %2 : vector<1x32xf32> to vector<2x32xf32>
    %284 = arith.addf %282, %283 : vector<2x32xf32>
    %cst_120 = arith.constant 0.998334705 : f32
    %285 = vector.broadcast %cst_120 : f32 to vector<2x32xf32>
    %286 = arith.mulf %285, %202 : vector<2x32xf32>
    %cst_121 = arith.constant 0.00166527857 : f32
    %287 = vector.broadcast %cst_121 : f32 to vector<2x32xf32>
    %288 = arith.mulf %287, %220 : vector<2x32xf32>
    %289 = arith.addf %286, %288 : vector<2x32xf32>
    %cst_122 = arith.constant 1.800000e+00 : f32
    %290 = vector.broadcast %cst_122 : f32 to vector<2x32xf32>
    %291 = arith.mulf %290, %289 : vector<2x32xf32>
    %cst_123 = arith.constant 0.00999999977 : f32
    %292 = vector.broadcast %cst_123 : f32 to vector<2x32xf32>
    %293 = arith.addf %292, %291 : vector<2x32xf32>
    %cst_124 = arith.constant 0.951229453 : f32
    %294 = vector.broadcast %cst_124 : f32 to vector<2x32xf32>
    %295 = arith.mulf %215, %294 : vector<2x32xf32>
    %cst_125 = arith.constant 0.0487705767 : f32
    %296 = vector.broadcast %cst_125 : f32 to vector<2x32xf32>
    %297 = arith.mulf %296, %284 : vector<2x32xf32>
    %298 = arith.addf %295, %297 : vector<2x32xf32>
    %299 = arith.mulf %293, %220 : vector<2x32xf32>
    %cst_126 = arith.constant 1.000000e+00 : f32
    %300 = vector.broadcast %cst_126 : f32 to vector<2x32xf32>
    %301 = arith.mulf %299, %300 : vector<2x32xf32>
    %302 = arith.subf %298, %301 : vector<2x32xf32>
    %303 = arith.subf %302, %293 : vector<2x32xf32>
    %cst_127 = arith.constant 0.000000e+00 : f32
    %304 = vector.broadcast %cst_127 : f32 to vector<2x32xf32>
    %305 = arith.cmpf ogt, %303, %304 : vector<2x32xf32>
    %306 = arith.extui %305 : vector<2x32xi1> to vector<2x32xi32>
    %307 = arith.sitofp %306 : vector<2x32xi32> to vector<2x32xf32>
    %308 = tpu.concatenate %307, %247 in 1 : vector<2x32xf32>, vector<2x32xf32> -> vector<2x64xf32>
    %cst_128 = arith.constant dense<0.000000e+00> : vector<2x32xf32>
    %309 = tpu.matmul %308, %3, %cst_128 {dimension_numbers = #tpu.dot_dimension_numbers<[1], [0], [0], [1], [0, 0, 1, 1], [], []>} : vector<2x64xf32>, vector<64x32xf32>, vector<2x32xf32> -> vector<2x32xf32>
    %310 = vector.broadcast %4 : vector<1x32xf32> to vector<2x32xf32>
    %311 = arith.addf %309, %310 : vector<2x32xf32>
    %cst_129 = arith.constant 0.998334705 : f32
    %312 = vector.broadcast %cst_129 : f32 to vector<2x32xf32>
    %313 = arith.mulf %312, %229 : vector<2x32xf32>
    %cst_130 = arith.constant 0.00166527857 : f32
    %314 = vector.broadcast %cst_130 : f32 to vector<2x32xf32>
    %315 = arith.mulf %314, %247 : vector<2x32xf32>
    %316 = arith.addf %313, %315 : vector<2x32xf32>
    %cst_131 = arith.constant 1.800000e+00 : f32
    %317 = vector.broadcast %cst_131 : f32 to vector<2x32xf32>
    %318 = arith.mulf %317, %316 : vector<2x32xf32>
    %cst_132 = arith.constant 0.00999999977 : f32
    %319 = vector.broadcast %cst_132 : f32 to vector<2x32xf32>
    %320 = arith.addf %319, %318 : vector<2x32xf32>
    %cst_133 = arith.constant 0.951229453 : f32
    %321 = vector.broadcast %cst_133 : f32 to vector<2x32xf32>
    %322 = arith.mulf %242, %321 : vector<2x32xf32>
    %cst_134 = arith.constant 0.0487705767 : f32
    %323 = vector.broadcast %cst_134 : f32 to vector<2x32xf32>
    %324 = arith.mulf %323, %311 : vector<2x32xf32>
    %325 = arith.addf %322, %324 : vector<2x32xf32>
    %326 = arith.mulf %320, %247 : vector<2x32xf32>
    %cst_135 = arith.constant 1.000000e+00 : f32
    %327 = vector.broadcast %cst_135 : f32 to vector<2x32xf32>
    %328 = arith.mulf %326, %327 : vector<2x32xf32>
    %329 = arith.subf %325, %328 : vector<2x32xf32>
    %330 = arith.subf %329, %320 : vector<2x32xf32>
    %cst_136 = arith.constant 0.000000e+00 : f32
    %331 = vector.broadcast %cst_136 : f32 to vector<2x32xf32>
    %332 = arith.cmpf ogt, %330, %331 : vector<2x32xf32>
    %333 = arith.extui %332 : vector<2x32xi1> to vector<2x32xi32>
    %334 = arith.sitofp %333 : vector<2x32xi32> to vector<2x32xf32>
    %335 = tpu.concatenate %334, %274 in 1 : vector<2x32xf32>, vector<2x32xf32> -> vector<2x64xf32>
    %cst_137 = arith.constant dense<0.000000e+00> : vector<2x32xf32>
    %336 = tpu.matmul %335, %5, %cst_137 {dimension_numbers = #tpu.dot_dimension_numbers<[1], [0], [0], [1], [0, 0, 1, 1], [], []>} : vector<2x64xf32>, vector<64x32xf32>, vector<2x32xf32> -> vector<2x32xf32>
    %337 = vector.broadcast %6 : vector<1x32xf32> to vector<2x32xf32>
    %338 = arith.addf %336, %337 : vector<2x32xf32>
    %cst_138 = arith.constant 0.998334705 : f32
    %339 = vector.broadcast %cst_138 : f32 to vector<2x32xf32>
    %340 = arith.mulf %339, %256 : vector<2x32xf32>
    %cst_139 = arith.constant 0.00166527857 : f32
    %341 = vector.broadcast %cst_139 : f32 to vector<2x32xf32>
    %342 = arith.mulf %341, %274 : vector<2x32xf32>
    %343 = arith.addf %340, %342 : vector<2x32xf32>
    %cst_140 = arith.constant 1.800000e+00 : f32
    %344 = vector.broadcast %cst_140 : f32 to vector<2x32xf32>
    %345 = arith.mulf %344, %343 : vector<2x32xf32>
    %cst_141 = arith.constant 0.00999999977 : f32
    %346 = vector.broadcast %cst_141 : f32 to vector<2x32xf32>
    %347 = arith.addf %346, %345 : vector<2x32xf32>
    %cst_142 = arith.constant 0.951229453 : f32
    %348 = vector.broadcast %cst_142 : f32 to vector<2x32xf32>
    %349 = arith.mulf %269, %348 : vector<2x32xf32>
    %cst_143 = arith.constant 0.0487705767 : f32
    %350 = vector.broadcast %cst_143 : f32 to vector<2x32xf32>
    %351 = arith.mulf %350, %338 : vector<2x32xf32>
    %352 = arith.addf %349, %351 : vector<2x32xf32>
    %353 = arith.mulf %347, %274 : vector<2x32xf32>
    %cst_144 = arith.constant 1.000000e+00 : f32
    %354 = vector.broadcast %cst_144 : f32 to vector<2x32xf32>
    %355 = arith.mulf %353, %354 : vector<2x32xf32>
    %356 = arith.subf %352, %355 : vector<2x32xf32>
    %357 = arith.subf %356, %347 : vector<2x32xf32>
    %cst_145 = arith.constant 0.000000e+00 : f32
    %358 = vector.broadcast %cst_145 : f32 to vector<2x32xf32>
    %359 = arith.cmpf ogt, %357, %358 : vector<2x32xf32>
    %360 = arith.extui %359 : vector<2x32xi1> to vector<2x32xi32>
    %361 = arith.sitofp %360 : vector<2x32xi32> to vector<2x32xf32>
    %cst_146 = arith.constant dense<0.000000e+00> : vector<2x4xf32>
    %362 = tpu.matmul %356, %7, %cst_146 {dimension_numbers = #tpu.dot_dimension_numbers<[1], [0], [0], [1], [0, 0, 1, 1], [], []>} : vector<2x32xf32>, vector<32x4xf32>, vector<2x4xf32> -> vector<2x4xf32>
    %363 = vector.broadcast %8 : vector<1x4xf32> to vector<2x4xf32>
    %364 = arith.addf %362, %363 : vector<2x4xf32>
    %365 = tpu.concatenate %364, %361, %356, %347 in 1 : vector<2x4xf32>, vector<2x32xf32>, vector<2x32xf32>, vector<2x32xf32> -> vector<2x100xf32>
    %366 = vector.extract_strided_slice %0 {offsets = [4, 0, 0], sizes = [1, 2, 16], strides = [1, 1, 1]} : vector<8x2x16xf32> to vector<1x2x16xf32>
    %367 = vector.shape_cast %366 : vector<1x2x16xf32> to vector<2x16xf32>
    %368 = tpu.concatenate %367, %307 in 1 : vector<2x16xf32>, vector<2x32xf32> -> vector<2x48xf32>
    %cst_147 = arith.constant dense<0.000000e+00> : vector<2x32xf32>
    %369 = tpu.matmul %368, %1, %cst_147 {dimension_numbers = #tpu.dot_dimension_numbers<[1], [0], [0], [1], [0, 0, 1, 1], [], []>} : vector<2x48xf32>, vector<48x32xf32>, vector<2x32xf32> -> vector<2x32xf32>
    %370 = vector.broadcast %2 : vector<1x32xf32> to vector<2x32xf32>
    %371 = arith.addf %369, %370 : vector<2x32xf32>
    %cst_148 = arith.constant 0.998334705 : f32
    %372 = vector.broadcast %cst_148 : f32 to vector<2x32xf32>
    %373 = arith.mulf %372, %289 : vector<2x32xf32>
    %cst_149 = arith.constant 0.00166527857 : f32
    %374 = vector.broadcast %cst_149 : f32 to vector<2x32xf32>
    %375 = arith.mulf %374, %307 : vector<2x32xf32>
    %376 = arith.addf %373, %375 : vector<2x32xf32>
    %cst_150 = arith.constant 1.800000e+00 : f32
    %377 = vector.broadcast %cst_150 : f32 to vector<2x32xf32>
    %378 = arith.mulf %377, %376 : vector<2x32xf32>
    %cst_151 = arith.constant 0.00999999977 : f32
    %379 = vector.broadcast %cst_151 : f32 to vector<2x32xf32>
    %380 = arith.addf %379, %378 : vector<2x32xf32>
    %cst_152 = arith.constant 0.951229453 : f32
    %381 = vector.broadcast %cst_152 : f32 to vector<2x32xf32>
    %382 = arith.mulf %302, %381 : vector<2x32xf32>
    %cst_153 = arith.constant 0.0487705767 : f32
    %383 = vector.broadcast %cst_153 : f32 to vector<2x32xf32>
    %384 = arith.mulf %383, %371 : vector<2x32xf32>
    %385 = arith.addf %382, %384 : vector<2x32xf32>
    %386 = arith.mulf %380, %307 : vector<2x32xf32>
    %cst_154 = arith.constant 1.000000e+00 : f32
    %387 = vector.broadcast %cst_154 : f32 to vector<2x32xf32>
    %388 = arith.mulf %386, %387 : vector<2x32xf32>
    %389 = arith.subf %385, %388 : vector<2x32xf32>
    %390 = arith.subf %389, %380 : vector<2x32xf32>
    %cst_155 = arith.constant 0.000000e+00 : f32
    %391 = vector.broadcast %cst_155 : f32 to vector<2x32xf32>
    %392 = arith.cmpf ogt, %390, %391 : vector<2x32xf32>
    %393 = arith.extui %392 : vector<2x32xi1> to vector<2x32xi32>
    %394 = arith.sitofp %393 : vector<2x32xi32> to vector<2x32xf32>
    %395 = tpu.concatenate %394, %334 in 1 : vector<2x32xf32>, vector<2x32xf32> -> vector<2x64xf32>
    %cst_156 = arith.constant dense<0.000000e+00> : vector<2x32xf32>
    %396 = tpu.matmul %395, %3, %cst_156 {dimension_numbers = #tpu.dot_dimension_numbers<[1], [0], [0], [1], [0, 0, 1, 1], [], []>} : vector<2x64xf32>, vector<64x32xf32>, vector<2x32xf32> -> vector<2x32xf32>
    %397 = vector.broadcast %4 : vector<1x32xf32> to vector<2x32xf32>
    %398 = arith.addf %396, %397 : vector<2x32xf32>
    %cst_157 = arith.constant 0.998334705 : f32
    %399 = vector.broadcast %cst_157 : f32 to vector<2x32xf32>
    %400 = arith.mulf %399, %316 : vector<2x32xf32>
    %cst_158 = arith.constant 0.00166527857 : f32
    %401 = vector.broadcast %cst_158 : f32 to vector<2x32xf32>
    %402 = arith.mulf %401, %334 : vector<2x32xf32>
    %403 = arith.addf %400, %402 : vector<2x32xf32>
    %cst_159 = arith.constant 1.800000e+00 : f32
    %404 = vector.broadcast %cst_159 : f32 to vector<2x32xf32>
    %405 = arith.mulf %404, %403 : vector<2x32xf32>
    %cst_160 = arith.constant 0.00999999977 : f32
    %406 = vector.broadcast %cst_160 : f32 to vector<2x32xf32>
    %407 = arith.addf %406, %405 : vector<2x32xf32>
    %cst_161 = arith.constant 0.951229453 : f32
    %408 = vector.broadcast %cst_161 : f32 to vector<2x32xf32>
    %409 = arith.mulf %329, %408 : vector<2x32xf32>
    %cst_162 = arith.constant 0.0487705767 : f32
    %410 = vector.broadcast %cst_162 : f32 to vector<2x32xf32>
    %411 = arith.mulf %410, %398 : vector<2x32xf32>
    %412 = arith.addf %409, %411 : vector<2x32xf32>
    %413 = arith.mulf %407, %334 : vector<2x32xf32>
    %cst_163 = arith.constant 1.000000e+00 : f32
    %414 = vector.broadcast %cst_163 : f32 to vector<2x32xf32>
    %415 = arith.mulf %413, %414 : vector<2x32xf32>
    %416 = arith.subf %412, %415 : vector<2x32xf32>
    %417 = arith.subf %416, %407 : vector<2x32xf32>
    %cst_164 = arith.constant 0.000000e+00 : f32
    %418 = vector.broadcast %cst_164 : f32 to vector<2x32xf32>
    %419 = arith.cmpf ogt, %417, %418 : vector<2x32xf32>
    %420 = arith.extui %419 : vector<2x32xi1> to vector<2x32xi32>
    %421 = arith.sitofp %420 : vector<2x32xi32> to vector<2x32xf32>
    %422 = tpu.concatenate %421, %361 in 1 : vector<2x32xf32>, vector<2x32xf32> -> vector<2x64xf32>
    %cst_165 = arith.constant dense<0.000000e+00> : vector<2x32xf32>
    %423 = tpu.matmul %422, %5, %cst_165 {dimension_numbers = #tpu.dot_dimension_numbers<[1], [0], [0], [1], [0, 0, 1, 1], [], []>} : vector<2x64xf32>, vector<64x32xf32>, vector<2x32xf32> -> vector<2x32xf32>
    %424 = vector.broadcast %6 : vector<1x32xf32> to vector<2x32xf32>
    %425 = arith.addf %423, %424 : vector<2x32xf32>
    %cst_166 = arith.constant 0.998334705 : f32
    %426 = vector.broadcast %cst_166 : f32 to vector<2x32xf32>
    %427 = arith.mulf %426, %343 : vector<2x32xf32>
    %cst_167 = arith.constant 0.00166527857 : f32
    %428 = vector.broadcast %cst_167 : f32 to vector<2x32xf32>
    %429 = arith.mulf %428, %361 : vector<2x32xf32>
    %430 = arith.addf %427, %429 : vector<2x32xf32>
    %cst_168 = arith.constant 1.800000e+00 : f32
    %431 = vector.broadcast %cst_168 : f32 to vector<2x32xf32>
    %432 = arith.mulf %431, %430 : vector<2x32xf32>
    %cst_169 = arith.constant 0.00999999977 : f32
    %433 = vector.broadcast %cst_169 : f32 to vector<2x32xf32>
    %434 = arith.addf %433, %432 : vector<2x32xf32>
    %cst_170 = arith.constant 0.951229453 : f32
    %435 = vector.broadcast %cst_170 : f32 to vector<2x32xf32>
    %436 = arith.mulf %356, %435 : vector<2x32xf32>
    %cst_171 = arith.constant 0.0487705767 : f32
    %437 = vector.broadcast %cst_171 : f32 to vector<2x32xf32>
    %438 = arith.mulf %437, %425 : vector<2x32xf32>
    %439 = arith.addf %436, %438 : vector<2x32xf32>
    %440 = arith.mulf %434, %361 : vector<2x32xf32>
    %cst_172 = arith.constant 1.000000e+00 : f32
    %441 = vector.broadcast %cst_172 : f32 to vector<2x32xf32>
    %442 = arith.mulf %440, %441 : vector<2x32xf32>
    %443 = arith.subf %439, %442 : vector<2x32xf32>
    %444 = arith.subf %443, %434 : vector<2x32xf32>
    %cst_173 = arith.constant 0.000000e+00 : f32
    %445 = vector.broadcast %cst_173 : f32 to vector<2x32xf32>
    %446 = arith.cmpf ogt, %444, %445 : vector<2x32xf32>
    %447 = arith.extui %446 : vector<2x32xi1> to vector<2x32xi32>
    %448 = arith.sitofp %447 : vector<2x32xi32> to vector<2x32xf32>
    %cst_174 = arith.constant dense<0.000000e+00> : vector<2x4xf32>
    %449 = tpu.matmul %443, %7, %cst_174 {dimension_numbers = #tpu.dot_dimension_numbers<[1], [0], [0], [1], [0, 0, 1, 1], [], []>} : vector<2x32xf32>, vector<32x4xf32>, vector<2x4xf32> -> vector<2x4xf32>
    %450 = vector.broadcast %8 : vector<1x4xf32> to vector<2x4xf32>
    %451 = arith.addf %449, %450 : vector<2x4xf32>
    %452 = tpu.concatenate %451, %448, %443, %434 in 1 : vector<2x4xf32>, vector<2x32xf32>, vector<2x32xf32>, vector<2x32xf32> -> vector<2x100xf32>
    %453 = vector.extract_strided_slice %0 {offsets = [5, 0, 0], sizes = [1, 2, 16], strides = [1, 1, 1]} : vector<8x2x16xf32> to vector<1x2x16xf32>
    %454 = vector.shape_cast %453 : vector<1x2x16xf32> to vector<2x16xf32>
    %455 = tpu.concatenate %454, %394 in 1 : vector<2x16xf32>, vector<2x32xf32> -> vector<2x48xf32>
    %cst_175 = arith.constant dense<0.000000e+00> : vector<2x32xf32>
    %456 = tpu.matmul %455, %1, %cst_175 {dimension_numbers = #tpu.dot_dimension_numbers<[1], [0], [0], [1], [0, 0, 1, 1], [], []>} : vector<2x48xf32>, vector<48x32xf32>, vector<2x32xf32> -> vector<2x32xf32>
    %457 = vector.broadcast %2 : vector<1x32xf32> to vector<2x32xf32>
    %458 = arith.addf %456, %457 : vector<2x32xf32>
    %cst_176 = arith.constant 0.998334705 : f32
    %459 = vector.broadcast %cst_176 : f32 to vector<2x32xf32>
    %460 = arith.mulf %459, %376 : vector<2x32xf32>
    %cst_177 = arith.constant 0.00166527857 : f32
    %461 = vector.broadcast %cst_177 : f32 to vector<2x32xf32>
    %462 = arith.mulf %461, %394 : vector<2x32xf32>
    %463 = arith.addf %460, %462 : vector<2x32xf32>
    %cst_178 = arith.constant 1.800000e+00 : f32
    %464 = vector.broadcast %cst_178 : f32 to vector<2x32xf32>
    %465 = arith.mulf %464, %463 : vector<2x32xf32>
    %cst_179 = arith.constant 0.00999999977 : f32
    %466 = vector.broadcast %cst_179 : f32 to vector<2x32xf32>
    %467 = arith.addf %466, %465 : vector<2x32xf32>
    %cst_180 = arith.constant 0.951229453 : f32
    %468 = vector.broadcast %cst_180 : f32 to vector<2x32xf32>
    %469 = arith.mulf %389, %468 : vector<2x32xf32>
    %cst_181 = arith.constant 0.0487705767 : f32
    %470 = vector.broadcast %cst_181 : f32 to vector<2x32xf32>
    %471 = arith.mulf %470, %458 : vector<2x32xf32>
    %472 = arith.addf %469, %471 : vector<2x32xf32>
    %473 = arith.mulf %467, %394 : vector<2x32xf32>
    %cst_182 = arith.constant 1.000000e+00 : f32
    %474 = vector.broadcast %cst_182 : f32 to vector<2x32xf32>
    %475 = arith.mulf %473, %474 : vector<2x32xf32>
    %476 = arith.subf %472, %475 : vector<2x32xf32>
    %477 = arith.subf %476, %467 : vector<2x32xf32>
    %cst_183 = arith.constant 0.000000e+00 : f32
    %478 = vector.broadcast %cst_183 : f32 to vector<2x32xf32>
    %479 = arith.cmpf ogt, %477, %478 : vector<2x32xf32>
    %480 = arith.extui %479 : vector<2x32xi1> to vector<2x32xi32>
    %481 = arith.sitofp %480 : vector<2x32xi32> to vector<2x32xf32>
    %482 = tpu.concatenate %481, %421 in 1 : vector<2x32xf32>, vector<2x32xf32> -> vector<2x64xf32>
    %cst_184 = arith.constant dense<0.000000e+00> : vector<2x32xf32>
    %483 = tpu.matmul %482, %3, %cst_184 {dimension_numbers = #tpu.dot_dimension_numbers<[1], [0], [0], [1], [0, 0, 1, 1], [], []>} : vector<2x64xf32>, vector<64x32xf32>, vector<2x32xf32> -> vector<2x32xf32>
    %484 = vector.broadcast %4 : vector<1x32xf32> to vector<2x32xf32>
    %485 = arith.addf %483, %484 : vector<2x32xf32>
    %cst_185 = arith.constant 0.998334705 : f32
    %486 = vector.broadcast %cst_185 : f32 to vector<2x32xf32>
    %487 = arith.mulf %486, %403 : vector<2x32xf32>
    %cst_186 = arith.constant 0.00166527857 : f32
    %488 = vector.broadcast %cst_186 : f32 to vector<2x32xf32>
    %489 = arith.mulf %488, %421 : vector<2x32xf32>
    %490 = arith.addf %487, %489 : vector<2x32xf32>
    %cst_187 = arith.constant 1.800000e+00 : f32
    %491 = vector.broadcast %cst_187 : f32 to vector<2x32xf32>
    %492 = arith.mulf %491, %490 : vector<2x32xf32>
    %cst_188 = arith.constant 0.00999999977 : f32
    %493 = vector.broadcast %cst_188 : f32 to vector<2x32xf32>
    %494 = arith.addf %493, %492 : vector<2x32xf32>
    %cst_189 = arith.constant 0.951229453 : f32
    %495 = vector.broadcast %cst_189 : f32 to vector<2x32xf32>
    %496 = arith.mulf %416, %495 : vector<2x32xf32>
    %cst_190 = arith.constant 0.0487705767 : f32
    %497 = vector.broadcast %cst_190 : f32 to vector<2x32xf32>
    %498 = arith.mulf %497, %485 : vector<2x32xf32>
    %499 = arith.addf %496, %498 : vector<2x32xf32>
    %500 = arith.mulf %494, %421 : vector<2x32xf32>
    %cst_191 = arith.constant 1.000000e+00 : f32
    %501 = vector.broadcast %cst_191 : f32 to vector<2x32xf32>
    %502 = arith.mulf %500, %501 : vector<2x32xf32>
    %503 = arith.subf %499, %502 : vector<2x32xf32>
    %504 = arith.subf %503, %494 : vector<2x32xf32>
    %cst_192 = arith.constant 0.000000e+00 : f32
    %505 = vector.broadcast %cst_192 : f32 to vector<2x32xf32>
    %506 = arith.cmpf ogt, %504, %505 : vector<2x32xf32>
    %507 = arith.extui %506 : vector<2x32xi1> to vector<2x32xi32>
    %508 = arith.sitofp %507 : vector<2x32xi32> to vector<2x32xf32>
    %509 = tpu.concatenate %508, %448 in 1 : vector<2x32xf32>, vector<2x32xf32> -> vector<2x64xf32>
    %cst_193 = arith.constant dense<0.000000e+00> : vector<2x32xf32>
    %510 = tpu.matmul %509, %5, %cst_193 {dimension_numbers = #tpu.dot_dimension_numbers<[1], [0], [0], [1], [0, 0, 1, 1], [], []>} : vector<2x64xf32>, vector<64x32xf32>, vector<2x32xf32> -> vector<2x32xf32>
    %511 = vector.broadcast %6 : vector<1x32xf32> to vector<2x32xf32>
    %512 = arith.addf %510, %511 : vector<2x32xf32>
    %cst_194 = arith.constant 0.998334705 : f32
    %513 = vector.broadcast %cst_194 : f32 to vector<2x32xf32>
    %514 = arith.mulf %513, %430 : vector<2x32xf32>
    %cst_195 = arith.constant 0.00166527857 : f32
    %515 = vector.broadcast %cst_195 : f32 to vector<2x32xf32>
    %516 = arith.mulf %515, %448 : vector<2x32xf32>
    %517 = arith.addf %514, %516 : vector<2x32xf32>
    %cst_196 = arith.constant 1.800000e+00 : f32
    %518 = vector.broadcast %cst_196 : f32 to vector<2x32xf32>
    %519 = arith.mulf %518, %517 : vector<2x32xf32>
    %cst_197 = arith.constant 0.00999999977 : f32
    %520 = vector.broadcast %cst_197 : f32 to vector<2x32xf32>
    %521 = arith.addf %520, %519 : vector<2x32xf32>
    %cst_198 = arith.constant 0.951229453 : f32
    %522 = vector.broadcast %cst_198 : f32 to vector<2x32xf32>
    %523 = arith.mulf %443, %522 : vector<2x32xf32>
    %cst_199 = arith.constant 0.0487705767 : f32
    %524 = vector.broadcast %cst_199 : f32 to vector<2x32xf32>
    %525 = arith.mulf %524, %512 : vector<2x32xf32>
    %526 = arith.addf %523, %525 : vector<2x32xf32>
    %527 = arith.mulf %521, %448 : vector<2x32xf32>
    %cst_200 = arith.constant 1.000000e+00 : f32
    %528 = vector.broadcast %cst_200 : f32 to vector<2x32xf32>
    %529 = arith.mulf %527, %528 : vector<2x32xf32>
    %530 = arith.subf %526, %529 : vector<2x32xf32>
    %531 = arith.subf %530, %521 : vector<2x32xf32>
    %cst_201 = arith.constant 0.000000e+00 : f32
    %532 = vector.broadcast %cst_201 : f32 to vector<2x32xf32>
    %533 = arith.cmpf ogt, %531, %532 : vector<2x32xf32>
    %534 = arith.extui %533 : vector<2x32xi1> to vector<2x32xi32>
    %535 = arith.sitofp %534 : vector<2x32xi32> to vector<2x32xf32>
    %cst_202 = arith.constant dense<0.000000e+00> : vector<2x4xf32>
    %536 = tpu.matmul %530, %7, %cst_202 {dimension_numbers = #tpu.dot_dimension_numbers<[1], [0], [0], [1], [0, 0, 1, 1], [], []>} : vector<2x32xf32>, vector<32x4xf32>, vector<2x4xf32> -> vector<2x4xf32>
    %537 = vector.broadcast %8 : vector<1x4xf32> to vector<2x4xf32>
    %538 = arith.addf %536, %537 : vector<2x4xf32>
    %539 = tpu.concatenate %538, %535, %530, %521 in 1 : vector<2x4xf32>, vector<2x32xf32>, vector<2x32xf32>, vector<2x32xf32> -> vector<2x100xf32>
    %540 = vector.extract_strided_slice %0 {offsets = [6, 0, 0], sizes = [1, 2, 16], strides = [1, 1, 1]} : vector<8x2x16xf32> to vector<1x2x16xf32>
    %541 = vector.shape_cast %540 : vector<1x2x16xf32> to vector<2x16xf32>
    %542 = tpu.concatenate %541, %481 in 1 : vector<2x16xf32>, vector<2x32xf32> -> vector<2x48xf32>
    %cst_203 = arith.constant dense<0.000000e+00> : vector<2x32xf32>
    %543 = tpu.matmul %542, %1, %cst_203 {dimension_numbers = #tpu.dot_dimension_numbers<[1], [0], [0], [1], [0, 0, 1, 1], [], []>} : vector<2x48xf32>, vector<48x32xf32>, vector<2x32xf32> -> vector<2x32xf32>
    %544 = vector.broadcast %2 : vector<1x32xf32> to vector<2x32xf32>
    %545 = arith.addf %543, %544 : vector<2x32xf32>
    %cst_204 = arith.constant 0.998334705 : f32
    %546 = vector.broadcast %cst_204 : f32 to vector<2x32xf32>
    %547 = arith.mulf %546, %463 : vector<2x32xf32>
    %cst_205 = arith.constant 0.00166527857 : f32
    %548 = vector.broadcast %cst_205 : f32 to vector<2x32xf32>
    %549 = arith.mulf %548, %481 : vector<2x32xf32>
    %550 = arith.addf %547, %549 : vector<2x32xf32>
    %cst_206 = arith.constant 1.800000e+00 : f32
    %551 = vector.broadcast %cst_206 : f32 to vector<2x32xf32>
    %552 = arith.mulf %551, %550 : vector<2x32xf32>
    %cst_207 = arith.constant 0.00999999977 : f32
    %553 = vector.broadcast %cst_207 : f32 to vector<2x32xf32>
    %554 = arith.addf %553, %552 : vector<2x32xf32>
    %cst_208 = arith.constant 0.951229453 : f32
    %555 = vector.broadcast %cst_208 : f32 to vector<2x32xf32>
    %556 = arith.mulf %476, %555 : vector<2x32xf32>
    %cst_209 = arith.constant 0.0487705767 : f32
    %557 = vector.broadcast %cst_209 : f32 to vector<2x32xf32>
    %558 = arith.mulf %557, %545 : vector<2x32xf32>
    %559 = arith.addf %556, %558 : vector<2x32xf32>
    %560 = arith.mulf %554, %481 : vector<2x32xf32>
    %cst_210 = arith.constant 1.000000e+00 : f32
    %561 = vector.broadcast %cst_210 : f32 to vector<2x32xf32>
    %562 = arith.mulf %560, %561 : vector<2x32xf32>
    %563 = arith.subf %559, %562 : vector<2x32xf32>
    %564 = arith.subf %563, %554 : vector<2x32xf32>
    %cst_211 = arith.constant 0.000000e+00 : f32
    %565 = vector.broadcast %cst_211 : f32 to vector<2x32xf32>
    %566 = arith.cmpf ogt, %564, %565 : vector<2x32xf32>
    %567 = arith.extui %566 : vector<2x32xi1> to vector<2x32xi32>
    %568 = arith.sitofp %567 : vector<2x32xi32> to vector<2x32xf32>
    %569 = tpu.concatenate %568, %508 in 1 : vector<2x32xf32>, vector<2x32xf32> -> vector<2x64xf32>
    %cst_212 = arith.constant dense<0.000000e+00> : vector<2x32xf32>
    %570 = tpu.matmul %569, %3, %cst_212 {dimension_numbers = #tpu.dot_dimension_numbers<[1], [0], [0], [1], [0, 0, 1, 1], [], []>} : vector<2x64xf32>, vector<64x32xf32>, vector<2x32xf32> -> vector<2x32xf32>
    %571 = vector.broadcast %4 : vector<1x32xf32> to vector<2x32xf32>
    %572 = arith.addf %570, %571 : vector<2x32xf32>
    %cst_213 = arith.constant 0.998334705 : f32
    %573 = vector.broadcast %cst_213 : f32 to vector<2x32xf32>
    %574 = arith.mulf %573, %490 : vector<2x32xf32>
    %cst_214 = arith.constant 0.00166527857 : f32
    %575 = vector.broadcast %cst_214 : f32 to vector<2x32xf32>
    %576 = arith.mulf %575, %508 : vector<2x32xf32>
    %577 = arith.addf %574, %576 : vector<2x32xf32>
    %cst_215 = arith.constant 1.800000e+00 : f32
    %578 = vector.broadcast %cst_215 : f32 to vector<2x32xf32>
    %579 = arith.mulf %578, %577 : vector<2x32xf32>
    %cst_216 = arith.constant 0.00999999977 : f32
    %580 = vector.broadcast %cst_216 : f32 to vector<2x32xf32>
    %581 = arith.addf %580, %579 : vector<2x32xf32>
    %cst_217 = arith.constant 0.951229453 : f32
    %582 = vector.broadcast %cst_217 : f32 to vector<2x32xf32>
    %583 = arith.mulf %503, %582 : vector<2x32xf32>
    %cst_218 = arith.constant 0.0487705767 : f32
    %584 = vector.broadcast %cst_218 : f32 to vector<2x32xf32>
    %585 = arith.mulf %584, %572 : vector<2x32xf32>
    %586 = arith.addf %583, %585 : vector<2x32xf32>
    %587 = arith.mulf %581, %508 : vector<2x32xf32>
    %cst_219 = arith.constant 1.000000e+00 : f32
    %588 = vector.broadcast %cst_219 : f32 to vector<2x32xf32>
    %589 = arith.mulf %587, %588 : vector<2x32xf32>
    %590 = arith.subf %586, %589 : vector<2x32xf32>
    %591 = arith.subf %590, %581 : vector<2x32xf32>
    %cst_220 = arith.constant 0.000000e+00 : f32
    %592 = vector.broadcast %cst_220 : f32 to vector<2x32xf32>
    %593 = arith.cmpf ogt, %591, %592 : vector<2x32xf32>
    %594 = arith.extui %593 : vector<2x32xi1> to vector<2x32xi32>
    %595 = arith.sitofp %594 : vector<2x32xi32> to vector<2x32xf32>
    %596 = tpu.concatenate %595, %535 in 1 : vector<2x32xf32>, vector<2x32xf32> -> vector<2x64xf32>
    %cst_221 = arith.constant dense<0.000000e+00> : vector<2x32xf32>
    %597 = tpu.matmul %596, %5, %cst_221 {dimension_numbers = #tpu.dot_dimension_numbers<[1], [0], [0], [1], [0, 0, 1, 1], [], []>} : vector<2x64xf32>, vector<64x32xf32>, vector<2x32xf32> -> vector<2x32xf32>
    %598 = vector.broadcast %6 : vector<1x32xf32> to vector<2x32xf32>
    %599 = arith.addf %597, %598 : vector<2x32xf32>
    %cst_222 = arith.constant 0.998334705 : f32
    %600 = vector.broadcast %cst_222 : f32 to vector<2x32xf32>
    %601 = arith.mulf %600, %517 : vector<2x32xf32>
    %cst_223 = arith.constant 0.00166527857 : f32
    %602 = vector.broadcast %cst_223 : f32 to vector<2x32xf32>
    %603 = arith.mulf %602, %535 : vector<2x32xf32>
    %604 = arith.addf %601, %603 : vector<2x32xf32>
    %cst_224 = arith.constant 1.800000e+00 : f32
    %605 = vector.broadcast %cst_224 : f32 to vector<2x32xf32>
    %606 = arith.mulf %605, %604 : vector<2x32xf32>
    %cst_225 = arith.constant 0.00999999977 : f32
    %607 = vector.broadcast %cst_225 : f32 to vector<2x32xf32>
    %608 = arith.addf %607, %606 : vector<2x32xf32>
    %cst_226 = arith.constant 0.951229453 : f32
    %609 = vector.broadcast %cst_226 : f32 to vector<2x32xf32>
    %610 = arith.mulf %530, %609 : vector<2x32xf32>
    %cst_227 = arith.constant 0.0487705767 : f32
    %611 = vector.broadcast %cst_227 : f32 to vector<2x32xf32>
    %612 = arith.mulf %611, %599 : vector<2x32xf32>
    %613 = arith.addf %610, %612 : vector<2x32xf32>
    %614 = arith.mulf %608, %535 : vector<2x32xf32>
    %cst_228 = arith.constant 1.000000e+00 : f32
    %615 = vector.broadcast %cst_228 : f32 to vector<2x32xf32>
    %616 = arith.mulf %614, %615 : vector<2x32xf32>
    %617 = arith.subf %613, %616 : vector<2x32xf32>
    %618 = arith.subf %617, %608 : vector<2x32xf32>
    %cst_229 = arith.constant 0.000000e+00 : f32
    %619 = vector.broadcast %cst_229 : f32 to vector<2x32xf32>
    %620 = arith.cmpf ogt, %618, %619 : vector<2x32xf32>
    %621 = arith.extui %620 : vector<2x32xi1> to vector<2x32xi32>
    %622 = arith.sitofp %621 : vector<2x32xi32> to vector<2x32xf32>
    %cst_230 = arith.constant dense<0.000000e+00> : vector<2x4xf32>
    %623 = tpu.matmul %617, %7, %cst_230 {dimension_numbers = #tpu.dot_dimension_numbers<[1], [0], [0], [1], [0, 0, 1, 1], [], []>} : vector<2x32xf32>, vector<32x4xf32>, vector<2x4xf32> -> vector<2x4xf32>
    %624 = vector.broadcast %8 : vector<1x4xf32> to vector<2x4xf32>
    %625 = arith.addf %623, %624 : vector<2x4xf32>
    %626 = tpu.concatenate %625, %622, %617, %608 in 1 : vector<2x4xf32>, vector<2x32xf32>, vector<2x32xf32>, vector<2x32xf32> -> vector<2x100xf32>
    %627 = vector.extract_strided_slice %0 {offsets = [7, 0, 0], sizes = [1, 2, 16], strides = [1, 1, 1]} : vector<8x2x16xf32> to vector<1x2x16xf32>
    %628 = vector.shape_cast %627 : vector<1x2x16xf32> to vector<2x16xf32>
    %629 = tpu.concatenate %628, %568 in 1 : vector<2x16xf32>, vector<2x32xf32> -> vector<2x48xf32>
    %cst_231 = arith.constant dense<0.000000e+00> : vector<2x32xf32>
    %630 = tpu.matmul %629, %1, %cst_231 {dimension_numbers = #tpu.dot_dimension_numbers<[1], [0], [0], [1], [0, 0, 1, 1], [], []>} : vector<2x48xf32>, vector<48x32xf32>, vector<2x32xf32> -> vector<2x32xf32>
    %631 = vector.broadcast %2 : vector<1x32xf32> to vector<2x32xf32>
    %632 = arith.addf %630, %631 : vector<2x32xf32>
    %cst_232 = arith.constant 0.998334705 : f32
    %633 = vector.broadcast %cst_232 : f32 to vector<2x32xf32>
    %634 = arith.mulf %633, %550 : vector<2x32xf32>
    %cst_233 = arith.constant 0.00166527857 : f32
    %635 = vector.broadcast %cst_233 : f32 to vector<2x32xf32>
    %636 = arith.mulf %635, %568 : vector<2x32xf32>
    %637 = arith.addf %634, %636 : vector<2x32xf32>
    %cst_234 = arith.constant 1.800000e+00 : f32
    %638 = vector.broadcast %cst_234 : f32 to vector<2x32xf32>
    %639 = arith.mulf %638, %637 : vector<2x32xf32>
    %cst_235 = arith.constant 0.00999999977 : f32
    %640 = vector.broadcast %cst_235 : f32 to vector<2x32xf32>
    %641 = arith.addf %640, %639 : vector<2x32xf32>
    %cst_236 = arith.constant 0.951229453 : f32
    %642 = vector.broadcast %cst_236 : f32 to vector<2x32xf32>
    %643 = arith.mulf %563, %642 : vector<2x32xf32>
    %cst_237 = arith.constant 0.0487705767 : f32
    %644 = vector.broadcast %cst_237 : f32 to vector<2x32xf32>
    %645 = arith.mulf %644, %632 : vector<2x32xf32>
    %646 = arith.addf %643, %645 : vector<2x32xf32>
    %647 = arith.mulf %641, %568 : vector<2x32xf32>
    %cst_238 = arith.constant 1.000000e+00 : f32
    %648 = vector.broadcast %cst_238 : f32 to vector<2x32xf32>
    %649 = arith.mulf %647, %648 : vector<2x32xf32>
    %650 = arith.subf %646, %649 : vector<2x32xf32>
    %651 = arith.subf %650, %641 : vector<2x32xf32>
    %cst_239 = arith.constant 0.000000e+00 : f32
    %652 = vector.broadcast %cst_239 : f32 to vector<2x32xf32>
    %653 = arith.cmpf ogt, %651, %652 : vector<2x32xf32>
    %654 = arith.extui %653 : vector<2x32xi1> to vector<2x32xi32>
    %655 = arith.sitofp %654 : vector<2x32xi32> to vector<2x32xf32>
    %656 = tpu.concatenate %655, %595 in 1 : vector<2x32xf32>, vector<2x32xf32> -> vector<2x64xf32>
    %cst_240 = arith.constant dense<0.000000e+00> : vector<2x32xf32>
    %657 = tpu.matmul %656, %3, %cst_240 {dimension_numbers = #tpu.dot_dimension_numbers<[1], [0], [0], [1], [0, 0, 1, 1], [], []>} : vector<2x64xf32>, vector<64x32xf32>, vector<2x32xf32> -> vector<2x32xf32>
    %658 = vector.broadcast %4 : vector<1x32xf32> to vector<2x32xf32>
    %659 = arith.addf %657, %658 : vector<2x32xf32>
    %cst_241 = arith.constant 0.998334705 : f32
    %660 = vector.broadcast %cst_241 : f32 to vector<2x32xf32>
    %661 = arith.mulf %660, %577 : vector<2x32xf32>
    %cst_242 = arith.constant 0.00166527857 : f32
    %662 = vector.broadcast %cst_242 : f32 to vector<2x32xf32>
    %663 = arith.mulf %662, %595 : vector<2x32xf32>
    %664 = arith.addf %661, %663 : vector<2x32xf32>
    %cst_243 = arith.constant 1.800000e+00 : f32
    %665 = vector.broadcast %cst_243 : f32 to vector<2x32xf32>
    %666 = arith.mulf %665, %664 : vector<2x32xf32>
    %cst_244 = arith.constant 0.00999999977 : f32
    %667 = vector.broadcast %cst_244 : f32 to vector<2x32xf32>
    %668 = arith.addf %667, %666 : vector<2x32xf32>
    %cst_245 = arith.constant 0.951229453 : f32
    %669 = vector.broadcast %cst_245 : f32 to vector<2x32xf32>
    %670 = arith.mulf %590, %669 : vector<2x32xf32>
    %cst_246 = arith.constant 0.0487705767 : f32
    %671 = vector.broadcast %cst_246 : f32 to vector<2x32xf32>
    %672 = arith.mulf %671, %659 : vector<2x32xf32>
    %673 = arith.addf %670, %672 : vector<2x32xf32>
    %674 = arith.mulf %668, %595 : vector<2x32xf32>
    %cst_247 = arith.constant 1.000000e+00 : f32
    %675 = vector.broadcast %cst_247 : f32 to vector<2x32xf32>
    %676 = arith.mulf %674, %675 : vector<2x32xf32>
    %677 = arith.subf %673, %676 : vector<2x32xf32>
    %678 = arith.subf %677, %668 : vector<2x32xf32>
    %cst_248 = arith.constant 0.000000e+00 : f32
    %679 = vector.broadcast %cst_248 : f32 to vector<2x32xf32>
    %680 = arith.cmpf ogt, %678, %679 : vector<2x32xf32>
    %681 = arith.extui %680 : vector<2x32xi1> to vector<2x32xi32>
    %682 = arith.sitofp %681 : vector<2x32xi32> to vector<2x32xf32>
    %683 = tpu.concatenate %682, %622 in 1 : vector<2x32xf32>, vector<2x32xf32> -> vector<2x64xf32>
    %cst_249 = arith.constant dense<0.000000e+00> : vector<2x32xf32>
    %684 = tpu.matmul %683, %5, %cst_249 {dimension_numbers = #tpu.dot_dimension_numbers<[1], [0], [0], [1], [0, 0, 1, 1], [], []>} : vector<2x64xf32>, vector<64x32xf32>, vector<2x32xf32> -> vector<2x32xf32>
    %685 = vector.broadcast %6 : vector<1x32xf32> to vector<2x32xf32>
    %686 = arith.addf %684, %685 : vector<2x32xf32>
    %cst_250 = arith.constant 0.998334705 : f32
    %687 = vector.broadcast %cst_250 : f32 to vector<2x32xf32>
    %688 = arith.mulf %687, %604 : vector<2x32xf32>
    %cst_251 = arith.constant 0.00166527857 : f32
    %689 = vector.broadcast %cst_251 : f32 to vector<2x32xf32>
    %690 = arith.mulf %689, %622 : vector<2x32xf32>
    %691 = arith.addf %688, %690 : vector<2x32xf32>
    %cst_252 = arith.constant 1.800000e+00 : f32
    %692 = vector.broadcast %cst_252 : f32 to vector<2x32xf32>
    %693 = arith.mulf %692, %691 : vector<2x32xf32>
    %cst_253 = arith.constant 0.00999999977 : f32
    %694 = vector.broadcast %cst_253 : f32 to vector<2x32xf32>
    %695 = arith.addf %694, %693 : vector<2x32xf32>
    %cst_254 = arith.constant 0.951229453 : f32
    %696 = vector.broadcast %cst_254 : f32 to vector<2x32xf32>
    %697 = arith.mulf %617, %696 : vector<2x32xf32>
    %cst_255 = arith.constant 0.0487705767 : f32
    %698 = vector.broadcast %cst_255 : f32 to vector<2x32xf32>
    %699 = arith.mulf %698, %686 : vector<2x32xf32>
    %700 = arith.addf %697, %699 : vector<2x32xf32>
    %701 = arith.mulf %695, %622 : vector<2x32xf32>
    %cst_256 = arith.constant 1.000000e+00 : f32
    %702 = vector.broadcast %cst_256 : f32 to vector<2x32xf32>
    %703 = arith.mulf %701, %702 : vector<2x32xf32>
    %704 = arith.subf %700, %703 : vector<2x32xf32>
    %705 = arith.subf %704, %695 : vector<2x32xf32>
    %cst_257 = arith.constant 0.000000e+00 : f32
    %706 = vector.broadcast %cst_257 : f32 to vector<2x32xf32>
    %707 = arith.cmpf ogt, %705, %706 : vector<2x32xf32>
    %708 = arith.extui %707 : vector<2x32xi1> to vector<2x32xi32>
    %709 = arith.sitofp %708 : vector<2x32xi32> to vector<2x32xf32>
    %cst_258 = arith.constant dense<0.000000e+00> : vector<2x4xf32>
    %710 = tpu.matmul %704, %7, %cst_258 {dimension_numbers = #tpu.dot_dimension_numbers<[1], [0], [0], [1], [0, 0, 1, 1], [], []>} : vector<2x32xf32>, vector<32x4xf32>, vector<2x4xf32> -> vector<2x4xf32>
    %711 = vector.broadcast %8 : vector<1x4xf32> to vector<2x4xf32>
    %712 = arith.addf %710, %711 : vector<2x4xf32>
    %713 = tpu.concatenate %712, %709, %704, %695 in 1 : vector<2x4xf32>, vector<2x32xf32>, vector<2x32xf32>, vector<2x32xf32> -> vector<2x100xf32>
    %714 = vector.shape_cast %104 : vector<2x100xf32> to vector<1x2x100xf32>
    %715 = vector.shape_cast %191 : vector<2x100xf32> to vector<1x2x100xf32>
    %716 = vector.shape_cast %278 : vector<2x100xf32> to vector<1x2x100xf32>
    %717 = vector.shape_cast %365 : vector<2x100xf32> to vector<1x2x100xf32>
    %718 = vector.shape_cast %452 : vector<2x100xf32> to vector<1x2x100xf32>
    %719 = vector.shape_cast %539 : vector<2x100xf32> to vector<1x2x100xf32>
    %720 = vector.shape_cast %626 : vector<2x100xf32> to vector<1x2x100xf32>
    %721 = vector.shape_cast %713 : vector<2x100xf32> to vector<1x2x100xf32>
    %722 = tpu.concatenate %714, %715, %716, %717, %718, %719, %720, %721 in 0 : vector<1x2x100xf32>, vector<1x2x100xf32>, vector<1x2x100xf32>, vector<1x2x100xf32>, vector<1x2x100xf32>, vector<1x2x100xf32>, vector<1x2x100xf32>, vector<1x2x100xf32> -> vector<8x2x100xf32>
    %cst_259 = arith.constant 0.000000e+00 : f32
    %723 = vector.broadcast %cst_259 : f32 to vector<8x2x28xf32>
    %724 = tpu.concatenate %722, %723 in 2 : vector<8x2x100xf32>, vector<8x2x28xf32> -> vector<8x2x128xf32>
    %725 = vector.shape_cast %724 : vector<8x2x128xf32> to vector<16x128xf32>
    %c0_260 = arith.constant 0 : index
    %c0_261 = arith.constant 0 : index
    %726 = vector.load %arg18[%c0_260, %c0_261] : memref<16x128xf32, #tpu.memory_space<vmem>>, vector<16x128xf32>
    tpu.vector_store %arg18[%c0_260, %c0_261], %725 {strides = array<i32>} : memref<16x128xf32, #tpu.memory_space<vmem>>, vector<16x128xf32>,
    %727 = tpu.concatenate %650, %677, %704, %655, %682, %709, %637, %664, %691 in 1 : vector<2x32xf32>, vector<2x32xf32>, vector<2x32xf32>, vector<2x32xf32>, vector<2x32xf32>, vector<2x32xf32>, vector<2x32xf32>, vector<2x32xf32>, vector<2x32xf32> -> vector<2x288xf32>
    %c0_262 = arith.constant 0 : index
    %c0_263 = arith.constant 0 : index
    %728 = vector.load %arg19[%c0_262, %c0_263] : memref<2x288xf32, #tpu.memory_space<vmem>>, vector<2x288xf32>
    tpu.vector_store %arg19[%c0_262, %c0_263], %727 {strides = array<i32>} : memref<2x288xf32, #tpu.memory_space<vmem>>, vector<2x288xf32>,
    return
  }
}

</mosaic_0001>

<bundles_post_ra>
// kernel: tpu_custom_call.1
= control target key start
LH: loop header
LB: loop body
LE: loop exit
PB: predicated region body
PF: predicated region fallthrough
CT: control target
= control target key end

     0   :  { %s5612_s0 = inlined_call_operand.vmem [shape: f32[8,2,16], index: 0, kind: input, shape index: {}]   ;;  %s5613_s1 = inlined_call_operand.vmem [shape: f32[48,32], index: 1, kind: input, shape index: {}]   ;;  %s5614_s2 = inlined_call_operand.vmem [shape: f32[1,32], index: 2, kind: input, shape index: {}]   ;;  %s5615_s3 = inlined_call_operand.vmem [shape: f32[64,32], index: 3, kind: input, shape index: {}]   ;;  %s5616_s4 = inlined_call_operand.vmem [shape: f32[1,32], index: 4, kind: input, shape index: {}]   ;;  %s5617_s5 = inlined_call_operand.vmem [shape: f32[64,32], index: 5, kind: input, shape index: {}]   ;;  %s5618_s6 = inlined_call_operand.vmem [shape: f32[1,32], index: 6, kind: input, shape index: {}]   ;;  %s5619_s7 = inlined_call_operand.vmem [shape: f32[32,4], index: 7, kind: input, shape index: {}]   ;;  %s5620_s8 = inlined_call_operand.vmem [shape: f32[1,4], index: 8, kind: input, shape index: {}]   ;;  %s5621_s9 = inlined_call_operand.vmem [shape: f32[2,32], index: 9, kind: input, shape index: {}]   ;;  %s5622_s10 = inlined_call_operand.vmem [shape: f32[2,32], index: 10, kind: input, shape index: {}]   ;;  %s5623_s11 = inlined_call_operand.vmem [shape: f32[2,32], index: 11, kind: input, shape index: {}]   ;;  %s5624_s12 = inlined_call_operand.vmem [shape: f32[2,32], index: 12, kind: input, shape index: {}]   ;;  %s5625_s13 = inlined_call_operand.vmem [shape: f32[2,32], index: 13, kind: input, shape index: {}]   ;;  %s5626_s14 = inlined_call_operand.vmem [shape: f32[2,32], index: 14, kind: input, shape index: {}]   ;;  %s5627_s15 = inlined_call_operand.vmem [shape: f32[2,32], index: 15, kind: input, shape index: {}]   ;;  %s5628_s16 = inlined_call_operand.vmem [shape: f32[2,32], index: 16, kind: input, shape index: {}]   ;;  %s5629_s17 = inlined_call_operand.vmem [shape: f32[2,32], index: 17, kind: input, shape index: {}]   ;;  %s5630_s18 = inlined_call_operand.hbm [shape: f32[16,128], index: 18, kind: output, shape index: {0}]   ;;  %s5631_s19 = inlined_call_operand.hbm [shape: f32[2,288], index: 19, kind: output, shape index: {1}]  }
   0x1   :  { %5636 = sst [smem:[#allocation8_spill]] %s5612_s0 }
   0x2   :  { %5637 = sst [smem:[#allocation9_spill]] %s5613_s1 }
   0x3   :  { %5638 = sst [smem:[#allocation10_spill]] %s5614_s2 }
   0x4   :  { %5639 = sst [smem:[#allocation11_spill]] %s5615_s3 }
   0x5   :  { %25 = vsyncpa [#allocation3], 0  ;;  %v4506_v0 = vld [vmem:[%s5624_s12] sm:$0x3]  ;;  %s4388_s20 = smov 16   ;;  %v4389_v1 = vmov 0.0|0.0  }
   0x6   :  { %111 = vrot.lane.b32.xlu0 %v4506_v0, %s4388_s20  ;;  %3990 = vmatprep.subr.bf16.mxu0 %v4389_v1  ;;  %s5640_s22 = sld [smem:[#allocation9_spill]]  ;;  %vm4390_vm0 = vmmov 0   ;;  %v4391_v7 = vmov 0.0   ;;  %v4531_v8 = vld [vmem:[%s5625_s13] sm:$0x3]  ;;  %s5641_s0 = sld [smem:[#allocation11_spill]] }
   0x7   :  { %3999 = vmatprep.subr.bf16.mxu1 %v4389_v1  ;;  %3490 = vmatprep.mubr.msk.f32.mxu0 %vm4390_vm0, %v4391_v7  ;;  %s4392_s2 = smov 32  }
   0x8   :  { %3509 = vmatprep.mubr.msk.f32.mxu1 %vm4390_vm0, %v4391_v7 }
   0xa   :  { %211 = vrot.lane.b32.xlu0 %v4531_v8, %s4392_s2 }
   0xc   :  { %v71_v2 = vld [vmem:[%s5640_s22] sm:$0xff]  ;;  %v72_v3 = vld [vmem:[%s5640_s22 + $0x8] sm:$0xff]  ;;  %v73_v5 = vld [vmem:[%s5640_s22 + $0x10] sm:$0xff] }
   0xd   :  { %v4517_v4 = vpack.c.bf16 %v72_v3, %v71_v2  ;;  %v74_v6 = vld [vmem:[%s5640_s22 + $0x18] sm:$0xff]  ;;  %v78_v10 = vld [vmem:[%s5641_s0] sm:$0xff]  ;;  %v76_v12 = vld [vmem:[%s5640_s22 + $0x28] sm:$0xff] }
   0xe   :  { %v4536_v9 = vpack.c.bf16 %v74_v6, %v73_v5  ;;  %v75_v11 = vld [vmem:[%s5640_s22 + $0x20] sm:$0xff]  ;;  %v79_v13 = vld [vmem:[%s5641_s0 + $0x8] sm:$0xff] }
   0xf   :  { %3992 = vmatpush3.bf16.msra.mxu0 %v4517_v4  ;;  %v4553_v14 = vpack.c.bf16 %v79_v13, %v78_v10 }
  0x10   :  { %3993 = vmatprep.subr.bf16.mxu0 %v4389_v1 }
  0x11   :  { %26 = vsyncpa [#allocation5], 0  ;;  %v4556_v15 = vpack.c.bf16 %v76_v12, %v75_v11  ;;  %4001 = vmatpush3.bf16.msra.mxu1 %v4553_v14  ;;  %vm114_vm1 = vcmask 130048   ;;  %s5642_s25 = sld [smem:[#allocation8_spill]]  ;;  %vm122_vm2 = vcmask 392192   ;;  %v80_v19 = vld [vmem:[%s5641_s0 + $0x10] sm:$0xff] }
  0x12   :  { %4002 = vmatprep.subr.bf16.mxu1 %v4389_v1  ;;  %v81_v20 = vld [vmem:[%s5641_s0 + $0x18] sm:$0xff]  ;;  %v82_v22 = vld [vmem:[%s5641_s0 + $0x20] sm:$0xff]  ;;  %v83_v23 = vld [vmem:[%s5641_s0 + $0x28] sm:$0xff]  ;;  %v197_v31 = vmul.f32 0.0016652786, %v4506_v0  ;;  %s5643_s28 = sld [smem:[#allocation10_spill]] }
  0x13   :  { %3995 = vmatpush3.bf16.msra.mxu0 %v4536_v9  ;;  %v4576_v21 = vpack.c.bf16 %v81_v20, %v80_v19  ;;  %v4586_v24 = vpack.c.bf16 %v83_v23, %v82_v22  ;;  %v4592_v25 = vld [vmem:[%s5626_s14] sm:$0x3]  ;;  %v84_v26 = vld [vmem:[%s5641_s0 + $0x30] sm:$0xff]  ;;  %v85_v27 = vld [vmem:[%s5641_s0 + $0x38] sm:$0xff]  ;;  %vm214_vm3 = vcmask 261120   ;;  %vm222_vm5 = vcmask 523264  }
  0x14   :  { %3996 = vmatprep.subr.bf16.mxu0 %v4389_v1  ;;  %311 = vrot.lane.b32.xlu1 %v4592_v25, %s4392_s2  ;;  %v4603_v28 = vpack.c.bf16 %v85_v27, %v84_v26  ;;  %v107_v29 = vld [vmem:[%s5627_s15] sm:$0x3]  ;;  %v88_v39 = vld [vmem:[%s5617_s5 + $0x8] sm:$0xff]  ;;  %v89_v58 = vld [vmem:[%s5617_s5 + $0x10] sm:$0xff]  ;;  %v297_v10 = vmul.f32 0.0016652786, %v4531_v8 }
  0x15   :  { %4004 = vmatpush3.bf16.msra.mxu1 %v4576_v21  ;;  %v196_v30 = vmul.f32 0.9983347, %v107_v29  ;;  %v101_v35 = vld [vmem:[%s5621_s9] sm:$0x3]  ;;  %v90_v59 = vld [vmem:[%s5617_s5 + $0x18] sm:$0xff]  ;;  %v92_v62 = vld [vmem:[%s5617_s5 + $0x28] sm:$0xff] }
  0x16   :  { %4005 = vmatprep.subr.bf16.mxu1 %v4389_v1  ;;  %v87_v38 = vld [vmem:[%s5617_s5] sm:$0xff]  ;;  %v201_v41 = vmul.f32 0.95122945, %v101_v35  ;;  %v4654_v60 = vpack.c.bf16 %v90_v59, %v89_v58  ;;  %v94_v2 = vld [vmem:[%s5617_s5 + $0x38] sm:$0xff]  ;;  %s4394_s3 = smov 36  }
  0x17   :  { %3998 = vmatpush3.bf16.msra.mxu0 %v4556_v15  ;;  %v63_v16 = vld [vmem:[%s5642_s25] sm:$0x3]  ;;  %v198_v32 = vadd.f32 %v197_v31, %v196_v30  ;;  %v4626_v43 = vpack.c.bf16 %v88_v39, %v87_v38 }
  0x18   :  { %4011 = vmatprep.subr.bf16.mxu0 %v4389_v1  ;;  %v4614_v34 = vld [vmem:[%s5643_s28] ss:$0 sm:$0xff] }
  0x19   :  { %4007 = vmatpush3.bf16.msra.mxu1 %v4586_v24  ;;  %v199_v33 = vmul.f32 1.8, %v198_v32  ;;  %v582_v50 = vmul.f32 0.9983347, %v198_v32  ;;  %v91_v61 = vld [vmem:[%s5617_s5 + $0x20] sm:$0xff] }
  0x1a   :  { %4008 = vmatprep.subr.bf16.mxu1 %v4389_v1  ;;  %v4664_v63 = vpack.c.bf16 %v92_v62, %v91_v61  ;;  %v108_v5 = vld [vmem:[%s5628_s16] sm:$0x3] }
  0x1b   :  { %v200_v36 = vadd.f32 0.01, %v199_v33  ;;  %v296_v6 = vmul.f32 0.9983347, %v108_v5  ;;  %v4685_v13 = vld [vmem:[%s5616_s4] ss:$0 sm:$0xff] }
  0x1d   :  { %4010 = vmatpush3.bf16.msra.mxu1 %v4603_v28  ;;  %v204_v44 = vmul.f32 %v200_v36, %v4506_v0  ;;  %v93_v0 = vld [vmem:[%s5617_s5 + $0x30] sm:$0xff]  ;;  %v298_v11 = vadd.f32 %v297_v10, %v296_v6 }
  0x1e   :  { %4023 = vmatprep.subr.bf16.mxu1 %v4389_v1  ;;  %v4674_v3 = vpack.c.bf16 %v94_v2, %v93_v0 }
  0x1f   :  { %v299_v12 = vmul.f32 1.8, %v298_v11  ;;  %v674_v31 = vmul.f32 0.9983347, %v298_v11 }
  0x78   :  { %v112_v17 = vpop.permute.xlu0 %111 }
  0x79   :  { %v115_v18 = vsel %vm114_vm1, %v63_v16, %v112_v17  ;;  %v102_v16 = vld [vmem:[%s5622_s10] sm:$0x3]  ;;  %v300_v17 = vadd.f32 0.01, %v299_v12  ;;  %v64_v12 = vld [vmem:[%s5642_s25 + $0x2] sm:$0x3] }
  0x7a   :  { %3491 = vmatmul.mubr.msk.f32.vlgmr.msra.gmra.mrb[0].mxu0 %vm122_vm2, %v115_v18  ;;  %v301_v20 = vmul.f32 0.95122945, %v102_v16 }
  0x7b   :  { %3528 = vmatprep.mubr.msk.f32.mxu0 %vm4390_vm0, %v4391_v7  ;;  %4013 = vmatpush3.bf16.msra.mxu0 %v4626_v43  ;;  %v304_v23 = vmul.f32 %v300_v17, %v4531_v8 }
  0x7c   :  { %4014 = vmatprep.subr.bf16.mxu0 %v4389_v1  ;;  %v212_v49 = vpop.permute.xlu0 %211 }
  0x7f   :  { %4016 = vmatpush3.bf16.msra.mxu0 %v4654_v60 }
  0x80   :  { %4017 = vmatprep.subr.bf16.mxu0 %v4389_v1 }
  0x83   :  { %4019 = vmatpush3.bf16.msra.mxu0 %v4664_v63 }
  0x84   :  { %4020 = vmatprep.subr.bf16.mxu0 %v4389_v1 }
  0x86   :  { %v312_v32 = vpop.permute.xlu1 %311 }
  0x87   :  { %4022 = vmatpush3.bf16.msra.mxu0 %v4674_v3 }
  0x88   :  { %4038 = vmatprep.subr.bf16.mxu0 %v4389_v1 }
 0x14d   :  { %v192_v37 = vpop.f32.mrb[0].mxu0 }
 0x14e   :  { %v193_v40 = vadd.f32 %v4614_v34, %v192_v37  ;;  %v3492_v42 = vpop.f32.mrb[1].mxu0 }
 0x150   :  { %v202_v45 = vmul.f32 0.048770577, %v193_v40  ;;  %v96_v40 = vld [vmem:[%s5619_s7] sm:$0xff] }
 0x152   :  { %v203_v46 = vadd.f32 %v202_v45, %v201_v41  ;;  %v97_v41 = vld [vmem:[%s5619_s7 + $0x8] sm:$0xff]  ;;  %v99_v45 = vld [vmem:[%s5619_s7 + $0x18] sm:$0xff] }
 0x153   :  { %v4723_v42 = vpack.c.bf16 %v97_v41, %v96_v40 }
 0x154   :  { %v4631_v47 = vsub.f32 %v203_v46, %v204_v44  ;;  %v98_v44 = vld [vmem:[%s5619_s7 + $0x10] sm:$0xff]  ;;  %s4398_s7 = smov 96  }
 0x155   :  { %v4733_v46 = vpack.c.bf16 %v99_v45, %v98_v44 }
 0x156   :  { %v206_v48 = vsub.f32 %v4631_v47, %v200_v36 }
 0x158   :  { %vm207_vm4 = vcmp.gt.f32.partialorder %v206_v48, 0.0  ;;  %v109_v48 = vld [vmem:[%s5629_s17] sm:$0x3] }
 0x159   :  { %v3180_v51 = vsel %vm207_vm4, 1.0, %v4391_v7 }
 0x15a   :  { %v215_v52 = vsel %vm214_vm3, %v3180_v51, %v212_v49  ;;  %v583_v53 = vmul.f32 0.0016652786, %v3180_v51  ;;  %505 = vrot.lane.b32.xlu1 %v3180_v51, %s4388_s20  ;;  %v394_v49 = vmul.f32 0.9983347, %v109_v48 }
 0x15b   :  { %3510 = vmatmul.mubr.msk.f32.vlgmr.msra.gmra.mrb[0].mxu1 %vm222_vm5, %v215_v52 }
 0x15c   :  { %3539 = vmatprep.mubr.msk.f32.mxu1 %vm4390_vm0, %v4391_v7  ;;  %v4640_v54 = vadd.f32 %v583_v53, %v582_v50  ;;  %4025 = vmatpush3.bf16.msra.mxu1 %v4723_v42  ;;  %v395_v50 = vmul.f32 0.0016652786, %v4592_v25  ;;  %v4747_v53 = vld [vmem:[%s5618_s6] ss:$0 sm:$0xff] }
 0x15d   :  { %4026 = vmatprep.subr.bf16.mxu1 %v4389_v1 }
 0x15e   :  { %v585_v55 = vmul.f32 1.8, %v4640_v54 }
 0x160   :  { %v4643_v56 = vadd.f32 0.01, %v585_v55  ;;  %4028 = vmatpush3.bf16.msra.mxu1 %v4733_v46  ;;  %v103_v55 = vld [vmem:[%s5623_s11] sm:$0x3] }
 0x161   :  { %4029 = vmatprep.subr.bf16.mxu1 %v4389_v1  ;;  %v399_v62 = vmul.f32 0.95122945, %v103_v55 }
 0x162   :  { %v4646_v57 = vmul.f32 %v3180_v51, %v4643_v56  ;;  %v4741_v51 = vadd.f32 %v395_v50, %v394_v49 }
 0x164   :  { %v397_v52 = vmul.f32 1.8, %v4741_v51 }
 0x166   :  { %v4752_v58 = vadd.f32 0.01, %v397_v52 }
 0x168   :  { %v402_v2 = vmul.f32 %v4752_v58, %v4592_v25 }
 0x1cc   :  { %v506_v16 = vpop.permute.xlu1 %505 }
 0x22e   :  { %v292_v18 = vpop.f32.mrb[0].mxu1 }
 0x22f   :  { %v293_v19 = vadd.f32 %v4685_v13, %v292_v18  ;;  %v3511_v22 = vpop.f32.mrb[1].mxu1 }
 0x231   :  { %v302_v26 = vmul.f32 0.048770577, %v293_v19 }
 0x233   :  { %v303_v27 = vadd.f32 %v302_v26, %v301_v20  ;;  %v587_v26 = vmul.f32 0.95122945, %v4631_v47 }
 0x235   :  { %v4692_v29 = vsub.f32 %v303_v27, %v304_v23 }
 0x237   :  { %v306_v30 = vsub.f32 %v4692_v29, %v300_v17  ;;  %v508_v17 = vsel %vm114_vm1, %v64_v12, %v506_v16  ;;  %v679_v48 = vmul.f32 0.95122945, %v4692_v29 }
 0x239   :  { %vm307_vm6 = vcmp.gt.f32.partialorder %v306_v30, 0.0 }
 0x23a   :  { %v3183_v33 = vsel %vm307_vm6, 1.0, %v4391_v7 }
 0x23b   :  { %597 = vrot.lane.b32.xlu0 %v3183_v33, %s4392_s2  ;;  %v675_v35 = vmul.f32 0.0016652786, %v3183_v33  ;;  %v314_v36 = vsel %vm214_vm3, %v3183_v33, %v312_v32 }
 0x23c   :  { %3529 = vmatmul.mubr.msk.f32.vlgmr.msra.gmra.mrb[2].mxu0 %vm222_vm5, %v314_v36  ;;  %v944_v36 = vmul.f32 0.9983347, %v4640_v54 }
 0x23d   :  { %v4699_v37 = vadd.f32 %v675_v35, %v674_v31  ;;  %4040 = vmatpush3.bf16.msra.mxu0 %v4553_v14  ;;  %3573 = vmatprep.mubr.msk.f32.mxu0 %vm4390_vm0, %v4391_v7 }
 0x23e   :  { %4041 = vmatprep.subr.bf16.mxu0 %v4389_v1 }
 0x23f   :  { %v677_v8 = vmul.f32 1.8, %v4699_v37 }
 0x241   :  { %4043 = vmatpush3.bf16.msra.mxu0 %v4576_v21  ;;  %v4707_v38 = vadd.f32 0.01, %v677_v8 }
 0x242   :  { %4044 = vmatprep.subr.bf16.mxu0 %v4389_v1 }
 0x243   :  { %v4711_v39 = vmul.f32 %v3183_v33, %v4707_v38 }
 0x245   :  { %4046 = vmatpush3.bf16.msra.mxu0 %v4586_v24 }
 0x246   :  { %4047 = vmatprep.subr.bf16.mxu0 %v4389_v1 }
 0x249   :  { %4049 = vmatpush3.bf16.msra.mxu0 %v4603_v28 }
 0x24a   :  { %4062 = vmatprep.subr.bf16.mxu0 %v4389_v1 }
 0x2ad   :  { %v598_v33 = vpop.permute.xlu0 %597 }
 0x30f   :  { %v390_v59 = vpop.f32.mrb[2].mxu0 }
 0x310   :  { %v391_v61 = vadd.f32 %v4747_v53, %v390_v59  ;;  %v3530_v0 = vpop.f32.mrb[3].mxu0 }
 0x312   :  { %v400_v5 = vmul.f32 0.048770577, %v391_v61 }
 0x314   :  { %v401_v6 = vadd.f32 %v400_v5, %v399_v62  ;;  %v1036_v62 = vmul.f32 0.9983347, %v4699_v37  ;;  %v765_v5 = vmul.f32 0.9983347, %v4741_v51 }
 0x316   :  { %v4757_v10 = vsub.f32 %v401_v6, %v402_v2 }
 0x318   :  { %3540 = vmatmul.mubr.msk.f32.vlgmr.msra.gmra.mrb[2].mxu1 %vm214_vm3, %v4757_v10  ;;  %v404_v11 = vsub.f32 %v4757_v10, %v4752_v58 }
 0x319   :  { %4031 = vmatpush3.bf16.msra.mxu1 %v4517_v4  ;;  %3554 = vmatprep.mubr.msk.f32.mxu1 %vm4390_vm0, %v4391_v7 }
 0x31a   :  { %4032 = vmatprep.subr.bf16.mxu1 %v4389_v1  ;;  %vm405_vm7 = vcmp.gt.f32.partialorder %v404_v11, 0.0 }
 0x31b   :  { %v4768_v25 = vsel %vm405_vm7, 1.0, %v4391_v7 }
 0x31c   :  { %688 = vrot.lane.b32.xlu1 %v4768_v25, %s4392_s2  ;;  %v766_v6 = vmul.f32 0.0016652786, %v4768_v25 }
 0x31d   :  { %4034 = vmatpush3.bf16.msra.mxu1 %v4536_v9 }
 0x31e   :  { %4035 = vmatprep.subr.bf16.mxu1 %v4389_v1  ;;  %v767_v11 = vadd.f32 %v766_v6, %v765_v5 }
 0x320   :  { %v768_v12 = vmul.f32 1.8, %v767_v11 }
 0x321   :  { %4037 = vmatpush3.bf16.msra.mxu1 %v4556_v15 }
 0x322   :  { %4050 = vmatprep.subr.bf16.mxu1 %v4389_v1 }
 0x324   :  { %3555 = vmatmul.mubr.msk.f32.vlgmr.msra.gmra.mrb[4].mxu1 %vm122_vm2, %v508_v17 }
 0x325   :  { %4052 = vmatpush3.bf16.msra.mxu1 %v4626_v43  ;;  %3592 = vmatprep.mubr.msk.f32.mxu1 %vm4390_vm0, %v4391_v7 }
 0x326   :  { %4053 = vmatprep.subr.bf16.mxu1 %v4389_v1 }
 0x329   :  { %4055 = vmatpush3.bf16.msra.mxu1 %v4654_v60 }
 0x32a   :  { %4056 = vmatprep.subr.bf16.mxu1 %v4389_v1 }
 0x32d   :  { %4058 = vmatpush3.bf16.msra.mxu1 %v4664_v63 }
 0x32e   :  { %4059 = vmatprep.subr.bf16.mxu1 %v4389_v1 }
 0x331   :  { %4061 = vmatpush3.bf16.msra.mxu1 %v4674_v3 }
 0x332   :  { %4077 = vmatprep.subr.bf16.mxu1 %v4389_v1 }
 0x38e   :  { %v689_v59 = vpop.permute.xlu1 %688 }
 0x3eb   :  { %v4791_v18 = vpop.f32.mrb[2].mxu1 }
 0x3ec   :  { %v3541_v19 = vpop.f32.mrb[3].mxu1 }
 0x3ed   :  { %v4852_v19 = vadd.f32 0.01, %v768_v12 }
 0x3f7   :  { %v578_v20 = vpop.f32.mrb[4].mxu1 }
 0x3f8   :  { %v579_v22 = vadd.f32 %v4614_v34, %v578_v20  ;;  %v3556_v23 = vpop.f32.mrb[5].mxu1 }
 0x3fa   :  { %v588_v27 = vmul.f32 0.048770577, %v579_v22  ;;  %v770_v22 = vmul.f32 0.95122945, %v4757_v10 }
 0x3fc   :  { %v589_v30 = vadd.f32 %v588_v27, %v587_v26  ;;  %v773_v27 = vmul.f32 %v4768_v25, %v4852_v19 }
 0x3fe   :  { %v4796_v31 = vsub.f32 %v589_v30, %v4646_v57 }
 0x400   :  { %v592_v32 = vsub.f32 %v4796_v31, %v4643_v56 }
 0x402   :  { %vm593_vm8 = vcmp.gt.f32.partialorder %v592_v32, 0.0 }
 0x403   :  { %v3190_v35 = vsel %vm593_vm8, 1.0, %v4391_v7 }
 0x404   :  { %867 = vrot.lane.b32.xlu0 %v3190_v35, %s4388_s20  ;;  %v945_v8 = vmul.f32 0.0016652786, %v3190_v35  ;;  %v600_v40 = vsel %vm214_vm3, %v3190_v35, %v598_v33  ;;  %v1127_v33 = vmul.f32 0.9983347, %v767_v11 }
 0x405   :  { %3574 = vmatmul.mubr.msk.f32.vlgmr.msra.gmra.mrb[4].mxu0 %vm222_vm5, %v600_v40 }
 0x406   :  { %v4805_v47 = vadd.f32 %v945_v8, %v944_v36  ;;  %4064 = vmatpush3.bf16.msra.mxu0 %v4723_v42  ;;  %3603 = vmatprep.mubr.msk.f32.mxu0 %vm4390_vm0, %v4391_v7  ;;  %v65_v8 = vld [vmem:[%s5642_s25 + $0x4] sm:$0x3] }
 0x407   :  { %4065 = vmatprep.subr.bf16.mxu0 %v4389_v1 }
 0x408   :  { %v947_v56 = vmul.f32 1.8, %v4805_v47 }
 0x40a   :  { %4067 = vmatpush3.bf16.msra.mxu0 %v4733_v46  ;;  %v4813_v54 = vadd.f32 0.01, %v947_v56 }
 0x40b   :  { %4068 = vmatprep.subr.bf16.mxu0 %v4389_v1 }
 0x40c   :  { %v4817_v57 = vmul.f32 %v3190_v35, %v4813_v54 }
 0x476   :  { %v868_v40 = vpop.permute.xlu0 %867 }
 0x477   :  { %v870_v56 = vsel %vm114_vm1, %v65_v8, %v868_v40 }
 0x4d8   :  { %v670_v41 = vpop.f32.mrb[4].mxu0 }
 0x4d9   :  { %v671_v44 = vadd.f32 %v4685_v13, %v670_v41  ;;  %v3575_v45 = vpop.f32.mrb[5].mxu0 }
 0x4db   :  { %v680_v49 = vmul.f32 0.048770577, %v671_v44 }
 0x4dd   :  { %v681_v50 = vadd.f32 %v680_v49, %v679_v48 }
 0x4df   :  { %v4822_v52 = vsub.f32 %v681_v50, %v4711_v39  ;;  %v949_v50 = vmul.f32 0.95122945, %v4796_v31 }
 0x4e1   :  { %v684_v55 = vsub.f32 %v4822_v52, %v4707_v38 }
 0x4e3   :  { %vm685_vm9 = vcmp.gt.f32.partialorder %v684_v55, 0.0 }
 0x4e4   :  { %v3192_v61 = vsel %vm685_vm9, 1.0, %v4391_v7 }
 0x4e5   :  { %959 = vrot.lane.b32.xlu1 %v3192_v61, %s4392_s2  ;;  %v1037_v0 = vmul.f32 0.0016652786, %v3192_v61  ;;  %v691_v2 = vsel %vm214_vm3, %v3192_v61, %v689_v59 }
 0x4e6   :  { %3593 = vmatmul.mubr.msk.f32.vlgmr.msra.gmra.mrb[6].mxu1 %vm222_vm5, %v691_v2 }
 0x4e7   :  { %v4831_v29 = vadd.f32 %v1037_v0, %v1036_v62  ;;  %4079 = vmatpush3.bf16.msra.mxu1 %v4553_v14  ;;  %3637 = vmatprep.mubr.msk.f32.mxu1 %vm4390_vm0, %v4391_v7 }
 0x4e8   :  { %4080 = vmatprep.subr.bf16.mxu1 %v4389_v1 }
 0x4e9   :  { %v1039_v38 = vmul.f32 1.8, %v4831_v29 }
 0x4eb   :  { %4082 = vmatpush3.bf16.msra.mxu1 %v4576_v21  ;;  %v4839_v37 = vadd.f32 0.01, %v1039_v38  ;;  %v1306_v38 = vmul.f32 0.9983347, %v4805_v47 }
 0x4ec   :  { %4083 = vmatprep.subr.bf16.mxu1 %v4389_v1 }
 0x4ed   :  { %v4843_v39 = vmul.f32 %v3192_v61, %v4839_v37 }
 0x4ef   :  { %4085 = vmatpush3.bf16.msra.mxu1 %v4586_v24 }
 0x4f0   :  { %4086 = vmatprep.subr.bf16.mxu1 %v4389_v1 }
 0x4f3   :  { %4088 = vmatpush3.bf16.msra.mxu1 %v4603_v28 }
 0x4f4   :  { %4101 = vmatprep.subr.bf16.mxu1 %v4389_v1 }
 0x557   :  { %v960_v0 = vpop.permute.xlu1 %959 }
 0x5b9   :  { %v761_v16 = vpop.f32.mrb[6].mxu1 }
 0x5ba   :  { %v762_v17 = vadd.f32 %v4747_v53, %v761_v16  ;;  %v3594_v20 = vpop.f32.mrb[7].mxu1 }
 0x5bc   :  { %v771_v23 = vmul.f32 0.048770577, %v762_v17  ;;  %v1041_v17 = vmul.f32 0.95122945, %v4822_v52 }
 0x5be   :  { %v772_v26 = vadd.f32 %v771_v23, %v770_v22 }
 0x5c0   :  { %v4857_v30 = vsub.f32 %v772_v26, %v773_v27 }
 0x5c2   :  { %3604 = vmatmul.mubr.msk.f32.vlgmr.msra.gmra.mrb[6].mxu0 %vm214_vm3, %v4857_v30  ;;  %v775_v51 = vsub.f32 %v4857_v30, %v4852_v19 }
 0x5c3   :  { %4070 = vmatpush3.bf16.msra.mxu0 %v4517_v4  ;;  %3618 = vmatprep.mubr.msk.f32.mxu0 %vm4390_vm0, %v4391_v7 }
 0x5c4   :  { %4071 = vmatprep.subr.bf16.mxu0 %v4389_v1  ;;  %vm776_vm10 = vcmp.gt.f32.partialorder %v775_v51, 0.0 }
 0x5c5   :  { %v4868_v32 = vsel %vm776_vm10, 1.0, %v4391_v7 }
 0x5c6   :  { %1050 = vrot.lane.b32.xlu0 %v4868_v32, %s4392_s2  ;;  %v1128_v35 = vmul.f32 0.0016652786, %v4868_v32 }
 0x5c7   :  { %4073 = vmatpush3.bf16.msra.mxu0 %v4536_v9 }
 0x5c8   :  { %v4874_v36 = vadd.f32 %v1128_v35, %v1127_v33  ;;  %4074 = vmatprep.subr.bf16.mxu0 %v4389_v1  ;;  %v1398_v33 = vmul.f32 0.9983347, %v4831_v29 }
 0x5ca   :  { %v1130_v40 = vmul.f32 1.8, %v4874_v36 }
 0x5cb   :  { %4076 = vmatpush3.bf16.msra.mxu0 %v4556_v15 }
 0x5cc   :  { %4089 = vmatprep.subr.bf16.mxu0 %v4389_v1 }
 0x5ce   :  { %3619 = vmatmul.mubr.msk.f32.vlgmr.msra.gmra.mrb[8].mxu0 %vm122_vm2, %v870_v56 }
 0x5cf   :  { %4091 = vmatpush3.bf16.msra.mxu0 %v4626_v43  ;;  %3656 = vmatprep.mubr.msk.f32.mxu0 %vm4390_vm0, %v4391_v7 }
 0x5d0   :  { %4092 = vmatprep.subr.bf16.mxu0 %v4389_v1 }
 0x5d3   :  { %4094 = vmatpush3.bf16.msra.mxu0 %v4654_v60 }
 0x5d4   :  { %4095 = vmatprep.subr.bf16.mxu0 %v4389_v1 }
 0x5d7   :  { %4097 = vmatpush3.bf16.msra.mxu0 %v4664_v63 }
 0x5d8   :  { %4098 = vmatprep.subr.bf16.mxu0 %v4389_v1 }
 0x5db   :  { %4100 = vmatpush3.bf16.msra.mxu0 %v4674_v3 }
 0x5dc   :  { %4116 = vmatprep.subr.bf16.mxu0 %v4389_v1 }
 0x638   :  { %v1051_v27 = vpop.permute.xlu0 %1050 }
 0x695   :  { %v4894_v41 = vpop.f32.mrb[6].mxu0 }
 0x696   :  { %v3605_v44 = vpop.f32.mrb[7].mxu0 }
 0x6a1   :  { %v940_v45 = vpop.f32.mrb[8].mxu0 }
 0x6a2   :  { %v941_v48 = vadd.f32 %v4614_v34, %v940_v45  ;;  %v3620_v49 = vpop.f32.mrb[9].mxu0  ;;  %v4954_v45 = vadd.f32 0.01, %v1130_v40 }
 0x6a3   :  { %v1132_v49 = vmul.f32 0.95122945, %v4857_v30 }
 0x6a4   :  { %v950_v55 = vmul.f32 0.048770577, %v941_v48 }
 0x6a6   :  { %v951_v59 = vadd.f32 %v950_v55, %v949_v50 }
 0x6a8   :  { %v4899_v61 = vsub.f32 %v951_v59, %v4817_v57  ;;  %v1135_v59 = vmul.f32 %v4868_v32, %v4954_v45 }
 0x6aa   :  { %v954_v62 = vsub.f32 %v4899_v61, %v4813_v54 }
 0x6ac   :  { %vm955_vm11 = vcmp.gt.f32.partialorder %v954_v62, 0.0 }
 0x6ad   :  { %v3197_v2 = vsel %vm955_vm11, 1.0, %v4391_v7 }
 0x6ae   :  { %1229 = vrot.lane.b32.xlu1 %v3197_v2, %s4388_s20  ;;  %v1307_v5 = vmul.f32 0.0016652786, %v3197_v2  ;;  %v962_v6 = vsel %vm214_vm3, %v3197_v2, %v960_v0 }
 0x6af   :  { %3638 = vmatmul.mubr.msk.f32.vlgmr.msra.gmra.mrb[8].mxu1 %vm222_vm5, %v962_v6 }
 0x6b0   :  { %v4908_v31 = vadd.f32 %v1307_v5, %v1306_v38  ;;  %4103 = vmatpush3.bf16.msra.mxu1 %v4723_v42  ;;  %3667 = vmatprep.mubr.msk.f32.mxu1 %vm4390_vm0, %v4391_v7  ;;  %v66_v38 = vld [vmem:[%s5642_s25 + $0x6] sm:$0x3] }
 0x6b1   :  { %4104 = vmatprep.subr.bf16.mxu1 %v4389_v1 }
 0x6b2   :  { %v1309_v54 = vmul.f32 1.8, %v4908_v31 }
 0x6b4   :  { %4106 = vmatpush3.bf16.msra.mxu1 %v4733_v46  ;;  %v4916_v47 = vadd.f32 0.01, %v1309_v54 }
 0x6b5   :  { %4107 = vmatprep.subr.bf16.mxu1 %v4389_v1 }
 0x6b6   :  { %v4920_v57 = vmul.f32 %v3197_v2, %v4916_v47 }
 0x720   :  { %v1230_v5 = vpop.permute.xlu1 %1229 }
 0x721   :  { %v1232_v6 = vsel %vm114_vm1, %v66_v38, %v1230_v5 }
 0x782   :  { %v1032_v11 = vpop.f32.mrb[8].mxu1 }
 0x783   :  { %v1033_v12 = vadd.f32 %v4685_v13, %v1032_v11  ;;  %v3639_v16 = vpop.f32.mrb[9].mxu1 }
 0x785   :  { %v1042_v20 = vmul.f32 0.048770577, %v1033_v12 }
 0x787   :  { %v1043_v22 = vadd.f32 %v1042_v20, %v1041_v17  ;;  %v1311_v20 = vmul.f32 0.95122945, %v4899_v61 }
 0x789   :  { %v4925_v23 = vsub.f32 %v1043_v22, %v4843_v39 }
 0x78b   :  { %v1046_v26 = vsub.f32 %v4925_v23, %v4839_v37 }
 0x78d   :  { %vm1047_vm12 = vcmp.gt.f32.partialorder %v1046_v26, 0.0 }
 0x78e   :  { %v3199_v51 = vsel %vm1047_vm12, 1.0, %v4391_v7 }
 0x78f   :  { %1321 = vrot.lane.b32.xlu0 %v3199_v51, %s4392_s2  ;;  %v1399_v35 = vmul.f32 0.0016652786, %v3199_v51  ;;  %v1053_v8 = vsel %vm214_vm3, %v3199_v51, %v1051_v27 }
 0x790   :  { %3657 = vmatmul.mubr.msk.f32.vlgmr.msra.gmra.mrb[10].mxu0 %vm222_vm5, %v1053_v8  ;;  %v1668_v8 = vmul.f32 0.9983347, %v4908_v31 }
 0x791   :  { %v4934_v52 = vadd.f32 %v1399_v35, %v1398_v33  ;;  %4118 = vmatpush3.bf16.msra.mxu0 %v4553_v14  ;;  %3701 = vmatprep.mubr.msk.f32.mxu0 %vm4390_vm0, %v4391_v7 }
 0x792   :  { %4119 = vmatprep.subr.bf16.mxu0 %v4389_v1 }
 0x793   :  { %v1401_v37 = vmul.f32 1.8, %v4934_v52 }
 0x795   :  { %4121 = vmatpush3.bf16.msra.mxu0 %v4576_v21  ;;  %v4942_v29 = vadd.f32 0.01, %v1401_v37 }
 0x796   :  { %4122 = vmatprep.subr.bf16.mxu0 %v4389_v1 }
 0x797   :  { %v4946_v39 = vmul.f32 %v3199_v51, %v4942_v29 }
 0x799   :  { %4124 = vmatpush3.bf16.msra.mxu0 %v4586_v24 }
 0x79a   :  { %4125 = vmatprep.subr.bf16.mxu0 %v4389_v1 }
 0x79d   :  { %4127 = vmatpush3.bf16.msra.mxu0 %v4603_v28 }
 0x79e   :  { %4140 = vmatprep.subr.bf16.mxu0 %v4389_v1 }
 0x801   :  { %v1322_v33 = vpop.permute.xlu0 %1321 }
 0x863   :  { %v1123_v56 = vpop.f32.mrb[10].mxu0 }
 0x864   :  { %v1124_v44 = vadd.f32 %v4747_v53, %v1123_v56  ;;  %v3658_v48 = vpop.f32.mrb[11].mxu0 }
 0x866   :  { %v1133_v50 = vmul.f32 0.048770577, %v1124_v44 }
 0x868   :  { %v1134_v55 = vadd.f32 %v1133_v50, %v1132_v49  ;;  %v1403_v49 = vmul.f32 0.95122945, %v4925_v23 }
 0x86a   :  { %v4959_v62 = vsub.f32 %v1134_v55, %v1135_v59 }
 0x86c   :  { %3668 = vmatmul.mubr.msk.f32.vlgmr.msra.gmra.mrb[10].mxu1 %vm214_vm3, %v4959_v62  ;;  %v1137_v0 = vsub.f32 %v4959_v62, %v4954_v45 }
 0x86d   :  { %4109 = vmatpush3.bf16.msra.mxu1 %v4517_v4  ;;  %3682 = vmatprep.mubr.msk.f32.mxu1 %vm4390_vm0, %v4391_v7 }
 0x86e   :  { %4110 = vmatprep.subr.bf16.mxu1 %v4389_v1  ;;  %vm1138_vm13 = vcmp.gt.f32.partialorder %v1137_v0, 0.0 }
 0x86f   :  { %v4970_v2 = vsel %vm1138_vm13, 1.0, %v4391_v7 }
 0x870   :  { %1412 = vrot.lane.b32.xlu1 %v4970_v2, %s4392_s2 }
 0x871   :  { %4112 = vmatpush3.bf16.msra.mxu1 %v4536_v9 }
 0x872   :  { %4113 = vmatprep.subr.bf16.mxu1 %v4389_v1 }
 0x875   :  { %4115 = vmatpush3.bf16.msra.mxu1 %v4556_v15 }
 0x876   :  { %4128 = vmatprep.subr.bf16.mxu1 %v4389_v1 }
 0x878   :  { %3683 = vmatmul.mubr.msk.f32.vlgmr.msra.gmra.mrb[12].mxu1 %vm122_vm2, %v1232_v6  ;;  %v1760_v6 = vmul.f32 0.9983347, %v4934_v52 }
 0x879   :  { %4130 = vmatpush3.bf16.msra.mxu1 %v4626_v43  ;;  %3720 = vmatprep.mubr.msk.f32.mxu1 %vm4390_vm0, %v4391_v7 }
 0x87a   :  { %4131 = vmatprep.subr.bf16.mxu1 %v4389_v1 }
 0x87d   :  { %4133 = vmatpush3.bf16.msra.mxu1 %v4654_v60 }
 0x87e   :  { %4134 = vmatprep.subr.bf16.mxu1 %v4389_v1 }
 0x881   :  { %4136 = vmatpush3.bf16.msra.mxu1 %v4664_v63 }
 0x882   :  { %4137 = vmatprep.subr.bf16.mxu1 %v4389_v1 }
 0x885   :  { %4139 = vmatpush3.bf16.msra.mxu1 %v4674_v3 }
 0x886   :  { %4155 = vmatprep.subr.bf16.mxu1 %v4389_v1 }
 0x8e2   :  { %v1413_v38 = vpop.permute.xlu1 %1412 }
 0x93f   :  { %v4993_v54 = vpop.f32.mrb[10].mxu1 }
 0x940   :  { %v3669_v11 = vpop.f32.mrb[11].mxu1 }
 0x94b   :  { %v1302_v12 = vpop.f32.mrb[12].mxu1 }
 0x94c   :  { %v1303_v16 = vadd.f32 %v4614_v34, %v1302_v12  ;;  %v3684_v17 = vpop.f32.mrb[13].mxu1 }
 0x94d   :  { %v1489_v17 = vmul.f32 0.9983347, %v4874_v36 }
 0x94e   :  { %v1312_v22 = vmul.f32 0.048770577, %v1303_v16  ;;  %v1490_v16 = vmul.f32 0.0016652786, %v4970_v2 }
 0x950   :  { %v1313_v26 = vadd.f32 %v1312_v22, %v1311_v20  ;;  %v1491_v20 = vadd.f32 %v1490_v16, %v1489_v17 }
 0x952   :  { %v4998_v27 = vsub.f32 %v1313_v26, %v4920_v57  ;;  %v1492_v22 = vmul.f32 1.8, %v1491_v20 }
 0x954   :  { %v1316_v51 = vsub.f32 %v4998_v27, %v4916_v47  ;;  %v1673_v16 = vmul.f32 0.95122945, %v4998_v27 }
 0x956   :  { %vm1317_vm14 = vcmp.gt.f32.partialorder %v1316_v51, 0.0 }
 0x957   :  { %v3204_v35 = vsel %vm1317_vm14, 1.0, %v4391_v7  ;;  %vm498_vm14 = vcmask 31744  }
 0x958   :  { %1591 = vrot.lane.b32.xlu0 %v3204_v35, %s4388_s20  ;;  %v1669_v37 = vmul.f32 0.0016652786, %v3204_v35  ;;  %v1324_v40 = vsel %vm214_vm3, %v3204_v35, %v1322_v33  ;;  %v5054_v33 = vadd.f32 0.01, %v1492_v22 }
 0x959   :  { %3702 = vmatmul.mubr.msk.f32.vlgmr.msra.gmra.mrb[12].mxu0 %vm222_vm5, %v1324_v40 }
 0x95a   :  { %v5007_v61 = vadd.f32 %v1669_v37, %v1668_v8  ;;  %4142 = vmatpush3.bf16.msra.mxu0 %v4723_v42  ;;  %3731 = vmatprep.mubr.msk.f32.mxu0 %vm4390_vm0, %v4391_v7  ;;  %v1494_v8 = vmul.f32 0.95122945, %v4959_v62 }
 0x95b   :  { %4143 = vmatprep.subr.bf16.mxu0 %v4389_v1 }
 0x95c   :  { %v1671_v47 = vmul.f32 1.8, %v5007_v61 }
 0x95e   :  { %4145 = vmatpush3.bf16.msra.mxu0 %v4733_v46  ;;  %v5015_v31 = vadd.f32 0.01, %v1671_v47  ;;  %v1497_v47 = vmul.f32 %v4970_v2, %v5054_v33 }
 0x95f   :  { %4146 = vmatprep.subr.bf16.mxu0 %v4389_v1 }
 0x960   :  { %v5019_v57 = vmul.f32 %v3204_v35, %v5015_v31 }
 0xa2c   :  { %v1394_v56 = vpop.f32.mrb[12].mxu0 }
 0xa2d   :  { %v1395_v44 = vadd.f32 %v4685_v13, %v1394_v56  ;;  %v3703_v48 = vpop.f32.mrb[13].mxu0 }
 0xa2e   :  { %v1851_v48 = vmul.f32 0.9983347, %v1491_v20 }
 0xa2f   :  { %v1404_v50 = vmul.f32 0.048770577, %v1395_v44 }
 0xa31   :  { %v1405_v55 = vadd.f32 %v1404_v50, %v1403_v49 }
 0xa33   :  { %v5024_v59 = vsub.f32 %v1405_v55, %v4946_v39  ;;  %v67_v55 = vld [vmem:[%s5642_s25 + $0x8] sm:$0x3] }
 0xa35   :  { %v1408_v0 = vsub.f32 %v5024_v59, %v4942_v29 }
 0xa37   :  { %vm1409_vm15 = vcmp.gt.f32.partialorder %v1408_v0, 0.0  ;;  %v1592_v0 = vpop.permute.xlu0 %1591 }
 0xa38   :  { %v3206_v5 = vsel %vm1409_vm15, 1.0, %v4391_v7 }
 0xa39   :  { %1683 = vrot.lane.b32.xlu1 %v3206_v5, %s4392_s2  ;;  %v1761_v11 = vmul.f32 0.0016652786, %v3206_v5  ;;  %v1415_v12 = vsel %vm214_vm3, %v3206_v5, %v1413_v38  ;;  %v1594_v38 = vsel %vm114_vm1, %v67_v55, %v1592_v0 }
 0xa3a   :  { %3721 = vmatmul.mubr.msk.f32.vlgmr.msra.gmra.mrb[14].mxu1 %vm222_vm5, %v1415_v12 }
 0xa3b   :  { %v5033_v23 = vadd.f32 %v1761_v11, %v1760_v6  ;;  %4157 = vmatpush3.bf16.msra.mxu1 %v4553_v14  ;;  %3765 = vmatprep.mubr.msk.f32.mxu1 %vm4390_vm0, %v4391_v7 }
 0xa3c   :  { %4158 = vmatprep.subr.bf16.mxu1 %v4389_v1 }
 0xa3d   :  { %v1763_v29 = vmul.f32 1.8, %v5033_v23 }
 0xa3f   :  { %4160 = vmatpush3.bf16.msra.mxu1 %v4576_v21  ;;  %v5041_v52 = vadd.f32 0.01, %v1763_v29 }
 0xa40   :  { %4161 = vmatprep.subr.bf16.mxu1 %v4389_v1 }
 0xa41   :  { %v5045_v39 = vmul.f32 %v3206_v5, %v5041_v52 }
 0xa43   :  { %4163 = vmatpush3.bf16.msra.mxu1 %v4586_v24 }
 0xa44   :  { %4164 = vmatprep.subr.bf16.mxu1 %v4389_v1 }
 0xa47   :  { %4166 = vmatpush3.bf16.msra.mxu1 %v4603_v28 }
 0xa48   :  { %4179 = vmatprep.subr.bf16.mxu1 %v4389_v1 }
 0xb0d   :  { %v1485_v26 = vpop.f32.mrb[14].mxu1 }
 0xb0e   :  { %v1486_v51 = vadd.f32 %v4747_v53, %v1485_v26  ;;  %v3722_v35 = vpop.f32.mrb[15].mxu1 }
 0xb10   :  { %v1495_v37 = vmul.f32 0.048770577, %v1486_v51  ;;  %v1684_v51 = vpop.permute.xlu1 %1683 }
 0xb12   :  { %v1496_v40 = vadd.f32 %v1495_v37, %v1494_v8  ;;  %v2030_v8 = vmul.f32 0.9983347, %v5007_v61 }
 0xb14   :  { %v5059_v56 = vsub.f32 %v1496_v40, %v1497_v47 }
 0xb16   :  { %3732 = vmatmul.mubr.msk.f32.vlgmr.msra.gmra.mrb[14].mxu0 %vm214_vm3, %v5059_v56  ;;  %v1499_v36 = vsub.f32 %v5059_v56, %v5054_v33 }
 0xb17   :  { %4148 = vmatpush3.bf16.msra.mxu0 %v4517_v4  ;;  %3746 = vmatprep.mubr.msk.f32.mxu0 %vm4390_vm0, %v4391_v7 }
 0xb18   :  { %4149 = vmatprep.subr.bf16.mxu0 %v4389_v1  ;;  %vm1500_vm4 = vcmp.gt.f32.partialorder %v1499_v36, 0.0 }
 0xb19   :  { %v5070_v44 = vsel %vm1500_vm4, 1.0, %v4391_v7  ;;  %vm3038_vm4 = vcmask 818176  }
 0xb1a   :  { %1774 = vrot.lane.b32.xlu0 %v5070_v44, %s4392_s2  ;;  %v1852_v49 = vmul.f32 0.0016652786, %v5070_v44 }
 0xb1b   :  { %4151 = vmatpush3.bf16.msra.mxu0 %v4536_v9 }
 0xb1c   :  { %v5076_v50 = vadd.f32 %v1852_v49, %v1851_v48  ;;  %4152 = vmatprep.subr.bf16.mxu0 %v4389_v1  ;;  %v1765_v48 = vmul.f32 0.95122945, %v5024_v59 }
 0xb1f   :  { %4154 = vmatpush3.bf16.msra.mxu0 %v4556_v15 }
 0xb20   :  { %4167 = vmatprep.subr.bf16.mxu0 %v4389_v1 }
 0xb22   :  { %3747 = vmatmul.mubr.msk.f32.vlgmr.msra.gmra.mrb[16].mxu0 %vm122_vm2, %v1594_v38 }
 0xb23   :  { %4169 = vmatpush3.bf16.msra.mxu0 %v4626_v43  ;;  %3784 = vmatprep.mubr.msk.f32.mxu0 %vm4390_vm0, %v4391_v7 }
 0xb24   :  { %4170 = vmatprep.subr.bf16.mxu0 %v4389_v1 }
 0xb27   :  { %4172 = vmatpush3.bf16.msra.mxu0 %v4654_v60 }
 0xb28   :  { %4173 = vmatprep.subr.bf16.mxu0 %v4389_v1 }
 0xb2b   :  { %4175 = vmatpush3.bf16.msra.mxu0 %v4664_v63 }
 0xb2c   :  { %4176 = vmatprep.subr.bf16.mxu0 %v4389_v1 }
 0xb2f   :  { %4178 = vmatpush3.bf16.msra.mxu0 %v4674_v3 }
 0xb30   :  { %4194 = vmatprep.subr.bf16.mxu0 %v4389_v1 }
 0xbe9   :  { %v5096_v5 = vpop.f32.mrb[14].mxu0 }
 0xbea   :  { %v3733_v6 = vpop.f32.mrb[15].mxu0 }
 0xbeb   :  { %v1775_v6 = vpop.permute.xlu0 %1774 }
 0xbf5   :  { %v1664_v11 = vpop.f32.mrb[16].mxu0 }
 0xbf6   :  { %v1665_v12 = vadd.f32 %v4614_v34, %v1664_v11  ;;  %v3748_v29 = vpop.f32.mrb[17].mxu0 }
 0xbf8   :  { %v1674_v17 = vmul.f32 0.048770577, %v1665_v12  ;;  %v2122_v12 = vmul.f32 0.9983347, %v5033_v23 }
 0xbfa   :  { %v1675_v20 = vadd.f32 %v1674_v17, %v1673_v16  ;;  %v1854_v17 = vmul.f32 1.8, %v5076_v50 }
 0xbfc   :  { %v5101_v22 = vsub.f32 %v1675_v20, %v5019_v57 }
 0xbfe   :  { %v1678_v26 = vsub.f32 %v5101_v22, %v5015_v31 }
 0xc00   :  { %vm1679_vm6 = vcmp.gt.f32.partialorder %v1678_v26, 0.0 }
 0xc01   :  { %v3211_v35 = vsel %vm1679_vm6, 1.0, %v4391_v7 }
 0xc02   :  { %1953 = vrot.lane.b32.xlu1 %v3211_v35, %s4388_s20  ;;  %v2031_v34 = vmul.f32 0.0016652786, %v3211_v35  ;;  %v1686_v37 = vsel %vm214_vm3, %v3211_v35, %v1684_v51  ;;  %v5156_v51 = vadd.f32 0.01, %v1854_v17 }
 0xc03   :  { %3766 = vmatmul.mubr.msk.f32.vlgmr.msra.gmra.mrb[16].mxu1 %vm222_vm5, %v1686_v37 }
 0xc04   :  { %v5110_v27 = vadd.f32 %v2031_v34, %v2030_v8  ;;  %4181 = vmatpush3.bf16.msra.mxu1 %v4723_v42  ;;  %3795 = vmatprep.mubr.msk.f32.mxu1 %vm4390_vm0, %v4391_v7  ;;  %v1856_v8 = vmul.f32 0.95122945, %v5059_v56 }
 0xc05   :  { %4182 = vmatprep.subr.bf16.mxu1 %v4389_v1 }
 0xc06   :  { %v2033_v31 = vmul.f32 1.8, %v5110_v27 }
 0xc08   :  { %4184 = vmatpush3.bf16.msra.mxu1 %v4733_v46  ;;  %v5118_v61 = vadd.f32 0.01, %v2033_v31  ;;  %v1859_v31 = vmul.f32 %v5070_v44, %v5156_v51 }
 0xc09   :  { %4185 = vmatprep.subr.bf16.mxu1 %v4389_v1 }
 0xc0a   :  { %v5122_v57 = vmul.f32 %v3211_v35, %v5118_v61 }
 0xcd6   :  { %v1756_v40 = vpop.f32.mrb[16].mxu1 }
 0xcd7   :  { %v1757_v47 = vadd.f32 %v4685_v13, %v1756_v40  ;;  %v3767_v36 = vpop.f32.mrb[17].mxu1 }
 0xcd9   :  { %v1766_v49 = vmul.f32 0.048770577, %v1757_v47 }
 0xcdb   :  { %v1767_v55 = vadd.f32 %v1766_v49, %v1765_v48  ;;  %v68_v48 = vld [vmem:[%s5642_s25 + $0xa] sm:$0x3]  ;;  %v1954_v49 = vpop.permute.xlu1 %1953 }
 0xcdd   :  { %v5127_v0 = vsub.f32 %v1767_v55, %v5045_v39  ;;  %v1956_v55 = vsel %vm114_vm1, %v68_v48, %v1954_v49 }
 0xcdf   :  { %v1770_v38 = vsub.f32 %v5127_v0, %v5041_v52 }
 0xce1   :  { %vm1771_vm7 = vcmp.gt.f32.partialorder %v1770_v38, 0.0 }
 0xce2   :  { %v3213_v11 = vsel %vm1771_vm7, 1.0, %v4391_v7 }
 0xce3   :  { %2045 = vrot.lane.b32.xlu0 %v3213_v11, %s4392_s2  ;;  %v2123_v29 = vmul.f32 0.0016652786, %v3213_v11  ;;  %v1777_v16 = vsel %vm214_vm3, %v3213_v11, %v1775_v6 }
 0xce4   :  { %3785 = vmatmul.mubr.msk.f32.vlgmr.msra.gmra.mrb[18].mxu0 %vm222_vm5, %v1777_v16 }
 0xce5   :  { %v5136_v59 = vadd.f32 %v2123_v29, %v2122_v12  ;;  %4196 = vmatpush3.bf16.msra.mxu0 %v4553_v14  ;;  %3829 = vmatprep.mubr.msk.f32.mxu0 %vm4390_vm0, %v4391_v7  ;;  %v5200_v12 = vld [vmem:[%s5643_s28] ss:$0 sm:$0xff] }
 0xce6   :  { %4197 = vmatprep.subr.bf16.mxu0 %v4389_v1 }
 0xce7   :  { %v2125_v52 = vmul.f32 1.8, %v5136_v59 }
 0xce9   :  { %4199 = vmatpush3.bf16.msra.mxu0 %v4576_v21  ;;  %v5144_v23 = vadd.f32 0.01, %v2125_v52  ;;  %v2035_v52 = vmul.f32 0.95122945, %v5101_v22 }
 0xcea   :  { %4200 = vmatprep.subr.bf16.mxu0 %v4389_v1 }
 0xceb   :  { %v5148_v39 = vmul.f32 %v3213_v11, %v5144_v23 }
 0xced   :  { %4202 = vmatpush3.bf16.msra.mxu0 %v4586_v24 }
 0xcee   :  { %4203 = vmatprep.subr.bf16.mxu0 %v4389_v1 }
 0xcf1   :  { %4205 = vmatpush3.bf16.msra.mxu0 %v4603_v28 }
 0xcf2   :  { %4218 = vmatprep.subr.bf16.mxu0 %v4389_v1 }
 0xdb7   :  { %v1847_v20 = vpop.f32.mrb[18].mxu0 }
 0xdb8   :  { %v1848_v26 = vadd.f32 %v4747_v53, %v1847_v20  ;;  %v3786_v35 = vpop.f32.mrb[19].mxu0 }
 0xdba   :  { %v1857_v34 = vmul.f32 0.048770577, %v1848_v26 }
 0xdbc   :  { %v1858_v37 = vadd.f32 %v1857_v34, %v1856_v8  ;;  %v2046_v8 = vpop.permute.xlu0 %2045 }
 0xdbe   :  { %v5161_v40 = vsub.f32 %v1858_v37, %v1859_v31  ;;  %v2392_v37 = vmul.f32 0.9983347, %v5110_v27 }
 0xdc0   :  { %3796 = vmatmul.mubr.msk.f32.vlgmr.msra.gmra.mrb[18].mxu1 %vm214_vm3, %v5161_v40  ;;  %v1861_v47 = vsub.f32 %v5161_v40, %v5156_v51 }
 0xdc1   :  { %4187 = vmatpush3.bf16.msra.mxu1 %v4517_v4  ;;  %3810 = vmatprep.mubr.msk.f32.mxu1 %vm4390_vm0, %v4391_v7 }
 0xdc2   :  { %4188 = vmatprep.subr.bf16.mxu1 %v4389_v1  ;;  %vm1862_vm8 = vcmp.gt.f32.partialorder %v1861_v47, 0.0 }
 0xdc3   :  { %v5172_v36 = vsel %vm1862_vm8, 1.0, %v4391_v7  ;;  %vm3117_vm8 = vcmask 785408  }
 0xdc4   :  { %2136 = vrot.lane.b32.xlu1 %v5172_v36, %s4392_s2 }
 0xdc5   :  { %4190 = vmatpush3.bf16.msra.mxu1 %v4536_v9 }
 0xdc6   :  { %4191 = vmatprep.subr.bf16.mxu1 %v4389_v1 }
 0xdc9   :  { %4193 = vmatpush3.bf16.msra.mxu1 %v4556_v15 }
 0xdca   :  { %4206 = vmatprep.subr.bf16.mxu1 %v4389_v1 }
 0xdcc   :  { %3811 = vmatmul.mubr.msk.f32.vlgmr.msra.gmra.mrb[20].mxu1 %vm122_vm2, %v1956_v55 }
 0xdcd   :  { %4208 = vmatpush3.bf16.msra.mxu1 %v4626_v43  ;;  %3848 = vmatprep.mubr.msk.f32.mxu1 %vm4390_vm0, %v4391_v7 }
 0xdce   :  { %4209 = vmatprep.subr.bf16.mxu1 %v4389_v1 }
 0xdd1   :  { %4211 = vmatpush3.bf16.msra.mxu1 %v4654_v60 }
 0xdd2   :  { %4212 = vmatprep.subr.bf16.mxu1 %v4389_v1 }
 0xdd5   :  { %4214 = vmatpush3.bf16.msra.mxu1 %v4664_v63 }
 0xdd6   :  { %4215 = vmatprep.subr.bf16.mxu1 %v4389_v1 }
 0xdd9   :  { %4217 = vmatpush3.bf16.msra.mxu1 %v4674_v3 }
 0xdda   :  { %4233 = vmatprep.subr.bf16.mxu1 %v4389_v1 }
 0xe93   :  { %v5195_v38 = vpop.f32.mrb[18].mxu1 }
 0xe94   :  { %v3797_v6 = vpop.f32.mrb[19].mxu1 }
 0xe95   :  { %v2127_v6 = vmul.f32 0.95122945, %v5127_v0 }
 0xe9f   :  { %v2026_v11 = vpop.f32.mrb[20].mxu1 }
 0xea0   :  { %v2027_v29 = vadd.f32 %v5200_v12, %v2026_v11  ;;  %v3812_v16 = vpop.f32.mrb[21].mxu1 }
 0xea2   :  { %v2036_v17 = vmul.f32 0.048770577, %v2027_v29 }
 0xea4   :  { %v2037_v20 = vadd.f32 %v2036_v17, %v2035_v52  ;;  %v2137_v17 = vpop.permute.xlu1 %2136 }
 0xea6   :  { %v5205_v26 = vsub.f32 %v2037_v20, %v5122_v57 }
 0xea8   :  { %v2040_v35 = vsub.f32 %v5205_v26, %v5118_v61 }
 0xeaa   :  { %vm2041_vm9 = vcmp.gt.f32.partialorder %v2040_v35, 0.0  ;;  %v2484_v35 = vmul.f32 0.9983347, %v5136_v59 }
 0xeab   :  { %v3218_v34 = vsel %vm2041_vm9, 1.0, %v4391_v7  ;;  %vm3142_vm9 = vcmask 1041408  }
 0xeac   :  { %2315 = vrot.lane.b32.xlu0 %v3218_v34, %s4388_s20  ;;  %v2393_v31 = vmul.f32 0.0016652786, %v3218_v34  ;;  %v2048_v47 = vsel %vm214_vm3, %v3218_v34, %v2046_v8 }
 0xead   :  { %3830 = vmatmul.mubr.msk.f32.vlgmr.msra.gmra.mrb[20].mxu0 %vm222_vm5, %v2048_v47 }
 0xeae   :  { %v5214_v22 = vadd.f32 %v2393_v31, %v2392_v37  ;;  %4220 = vmatpush3.bf16.msra.mxu0 %v4723_v42  ;;  %3859 = vmatprep.mubr.msk.f32.mxu0 %vm4390_vm0, %v4391_v7  ;;  %v2213_v37 = vmul.f32 0.9983347, %v5076_v50 }
 0xeaf   :  { %4221 = vmatprep.subr.bf16.mxu0 %v4389_v1 }
 0xeb0   :  { %v2395_v61 = vmul.f32 1.8, %v5214_v22 }
 0xeb2   :  { %4223 = vmatpush3.bf16.msra.mxu0 %v4733_v46  ;;  %v5222_v27 = vadd.f32 0.01, %v2395_v61 }
 0xeb3   :  { %4224 = vmatprep.subr.bf16.mxu0 %v4389_v1 }
 0xeb4   :  { %v5226_v57 = vmul.f32 %v3218_v34, %v5222_v27  ;;  %v2214_v34 = vmul.f32 0.0016652786, %v5172_v36 }
 0xeb6   :  { %v2215_v31 = vadd.f32 %v2214_v34, %v2213_v37 }
 0xeb8   :  { %v2216_v47 = vmul.f32 1.8, %v2215_v31 }
 0xf80   :  { %v2118_v48 = vpop.f32.mrb[20].mxu0 }
 0xf81   :  { %v2119_v49 = vadd.f32 %v4685_v13, %v2118_v48  ;;  %v3831_v55 = vpop.f32.mrb[21].mxu0 }
 0xf83   :  { %v2128_v11 = vmul.f32 0.048770577, %v2119_v49  ;;  %v5261_v49 = vadd.f32 0.01, %v2216_v47 }
 0xf85   :  { %v2129_v29 = vadd.f32 %v2128_v11, %v2127_v6  ;;  %v2218_v6 = vmul.f32 0.95122945, %v5161_v40 }
 0xf87   :  { %v5231_v16 = vsub.f32 %v2129_v29, %v5148_v39 }
 0xf89   :  { %v2132_v52 = vsub.f32 %v5231_v16, %v5144_v23 }
 0xf8b   :  { %vm2133_vm10 = vcmp.gt.f32.partialorder %v2132_v52, 0.0  ;;  %v2221_v52 = vmul.f32 %v5172_v36, %v5261_v49 }
 0xf8c   :  { %v3220_v20 = vsel %vm2133_vm10, 1.0, %v4391_v7  ;;  %vm3143_vm10 = vcmask 1043458  }
 0xf8d   :  { %2407 = vrot.lane.b32.xlu1 %v3220_v20, %s4392_s2  ;;  %v2485_v13 = vmul.f32 0.0016652786, %v3220_v20  ;;  %v2139_v8 = vsel %vm214_vm3, %v3220_v20, %v2137_v17 }
 0xf8e   :  { %3849 = vmatmul.mubr.msk.f32.vlgmr.msra.gmra.mrb[22].mxu1 %vm222_vm5, %v2139_v8  ;;  %v69_v8 = vld [vmem:[%s5642_s25 + $0xc] sm:$0x3] }
 0xf8f   :  { %v5240_v0 = vadd.f32 %v2485_v13, %v2484_v35  ;;  %4235 = vmatpush3.bf16.msra.mxu1 %v4553_v14  ;;  %3893 = vmatprep.mubr.msk.f32.mxu1 %vm4390_vm0, %v4391_v7 }
 0xf90   :  { %4236 = vmatprep.subr.bf16.mxu1 %v4389_v1 }
 0xf91   :  { %v2487_v23 = vmul.f32 1.8, %v5240_v0 }
 0xf93   :  { %4238 = vmatpush3.bf16.msra.mxu1 %v4576_v21  ;;  %v5248_v59 = vadd.f32 0.01, %v2487_v23  ;;  %v2316_v23 = vpop.permute.xlu0 %2315 }
 0xf94   :  { %4239 = vmatprep.subr.bf16.mxu1 %v4389_v1 }
 0xf95   :  { %v5252_v39 = vmul.f32 %v3220_v20, %v5248_v59  ;;  %v2575_v20 = vmul.f32 0.9983347, %v2215_v31  ;;  %v2318_v31 = vsel %vm114_vm1, %v69_v8, %v2316_v23 }
 0xf97   :  { %4241 = vmatpush3.bf16.msra.mxu1 %v4586_v24 }
 0xf98   :  { %4242 = vmatprep.subr.bf16.mxu1 %v4389_v1 }
 0xf9b   :  { %4244 = vmatpush3.bf16.msra.mxu1 %v4603_v28 }
 0xf9c   :  { %4257 = vmatprep.subr.bf16.mxu1 %v4389_v1 }
 0xfff   :  { %v2408_v8 = vpop.permute.xlu1 %2407 }
0x1061   :  { %v2209_v61 = vpop.f32.mrb[22].mxu1 }
0x1062   :  { %v2210_v48 = vadd.f32 %v4747_v53, %v2209_v61  ;;  %v3850_v55 = vpop.f32.mrb[23].mxu1 }
0x1064   :  { %v2219_v11 = vmul.f32 0.048770577, %v2210_v48 }
0x1066   :  { %v2220_v29 = vadd.f32 %v2219_v11, %v2218_v6 }
0x1068   :  { %v5266_v17 = vsub.f32 %v2220_v29, %v2221_v52  ;;  %v2397_v29 = vmul.f32 0.95122945, %v5205_v26  ;;  %v2754_v26 = vmul.f32 0.9983347, %v5214_v22  ;;  %v5340_v22 = vld [vmem:[%s5616_s4] ss:$0 sm:$0xff] }
0x1069   :  { %s4393_s4 = smov 4  }
0x106a   :  { %3860 = vmatmul.mubr.msk.f32.vlgmr.msra.gmra.mrb[22].mxu0 %vm214_vm3, %v5266_v17  ;;  %v2223_v50 = vsub.f32 %v5266_v17, %v5261_v49 }
0x106b   :  { %4226 = vmatpush3.bf16.msra.mxu0 %v4517_v4  ;;  %3874 = vmatprep.mubr.msk.f32.mxu0 %vm4390_vm0, %v4391_v7 }
0x106c   :  { %4227 = vmatprep.subr.bf16.mxu0 %v4389_v1  ;;  %vm2224_vm11 = vcmp.gt.f32.partialorder %v2223_v50, 0.0 }
0x106d   :  { %v5277_v53 = vsel %vm2224_vm11, 1.0, %v4391_v7  ;;  %vm3144_vm11 = vmor %vm3143_vm10, %vm3142_vm9 }
0x106e   :  { %2498 = vrot.lane.b32.xlu0 %v5277_v53, %s4392_s2  ;;  %v2576_v35 = vmul.f32 0.0016652786, %v5277_v53 }
0x106f   :  { %4229 = vmatpush3.bf16.msra.mxu0 %v4536_v9 }
0x1070   :  { %v5283_v13 = vadd.f32 %v2576_v35, %v2575_v20  ;;  %4230 = vmatprep.subr.bf16.mxu0 %v4389_v1 }
0x1072   :  { %v2578_v34 = vmul.f32 1.8, %v5283_v13 }
0x1073   :  { %4232 = vmatpush3.bf16.msra.mxu0 %v4556_v15 }
0x1074   :  { %4245 = vmatprep.subr.bf16.mxu0 %v4389_v1  ;;  %v5292_v37 = vadd.f32 0.01, %v2578_v34 }
0x1076   :  { %3875 = vmatmul.mubr.msk.f32.vlgmr.msra.gmra.mrb[24].mxu0 %vm122_vm2, %v2318_v31  ;;  %v5298_v47 = vmul.f32 %v5277_v53, %v5292_v37 }
0x1077   :  { %4247 = vmatpush3.bf16.msra.mxu0 %v4626_v43  ;;  %3912 = vmatprep.mubr.msk.f32.mxu0 %vm4390_vm0, %v4391_v7 }
0x1078   :  { %4248 = vmatprep.subr.bf16.mxu0 %v4389_v1 }
0x107b   :  { %4250 = vmatpush3.bf16.msra.mxu0 %v4654_v60 }
0x107c   :  { %4251 = vmatprep.subr.bf16.mxu0 %v4389_v1 }
0x107f   :  { %4253 = vmatpush3.bf16.msra.mxu0 %v4664_v63 }
0x1080   :  { %4254 = vmatprep.subr.bf16.mxu0 %v4389_v1 }
0x1083   :  { %4256 = vmatpush3.bf16.msra.mxu0 %v4674_v3 }
0x1084   :  { %4272 = vmatprep.subr.bf16.mxu0 %v4389_v1 }
0x113d   :  { %v5310_v61 = vpop.f32.mrb[22].mxu0 }
0x113e   :  { %v3861_v48 = vpop.f32.mrb[23].mxu0 }
0x1149   :  { %v2388_v55 = vpop.f32.mrb[24].mxu0 }
0x114a   :  { %v2389_v6 = vadd.f32 %v5200_v12, %v2388_v55  ;;  %v3876_v11 = vpop.f32.mrb[25].mxu0 }
0x114c   :  { %v2398_v52 = vmul.f32 0.048770577, %v2389_v6  ;;  %v2489_v6 = vmul.f32 0.95122945, %v5231_v16 }
0x114e   :  { %v2399_v50 = vadd.f32 %v2398_v52, %v2397_v29 }
0x1150   :  { %v5315_v20 = vsub.f32 %v2399_v50, %v5226_v57 }
0x1152   :  { %v2402_v35 = vsub.f32 %v5315_v20, %v5222_v27 }
0x1154   :  { %vm2403_vm12 = vcmp.gt.f32.partialorder %v2402_v35, 0.0  ;;  %v2499_v35 = vpop.permute.xlu0 %2498 }
0x1155   :  { %v5320_v23 = vsel %vm2403_vm12, 1.0, %v4391_v7  ;;  %vm3145_vm12 = vcmask 259076  }
0x1156   :  { %2677 = vrot.lane.b32.xlu1 %v5320_v23, %s4388_s20  ;;  %v2410_v34 = vsel %vm214_vm3, %v5320_v23, %v2408_v8  ;;  %v2755_v31 = vmul.f32 0.0016652786, %v5320_v23 }
0x1157   :  { %3894 = vmatmul.mubr.msk.f32.vlgmr.msra.gmra.mrb[24].mxu1 %vm222_vm5, %v2410_v34  ;;  %v2846_v34 = vmul.f32 0.9983347, %v5240_v0  ;;  %v4327_v0 = vpack.i.bf16 %v5277_v53, %v5172_v36 }
0x1158   :  { %4259 = vmatpush3.bf16.msra.mxu1 %v4723_v42  ;;  %3923 = vmatprep.mubr.msk.f32.mxu1 %vm4390_vm0, %v4391_v7  ;;  %v5332_v27 = vadd.f32 %v2755_v31, %v2754_v26  ;;  %v5405_v31 = vld [vmem:[%s5618_s6] ss:$0 sm:$0xff]  ;;  %s4395_s6 = smov 68  }
0x1159   :  { %4260 = vmatprep.subr.bf16.mxu1 %v4389_v1 }
0x115c   :  { %4262 = vmatpush3.bf16.msra.mxu1 %v4733_v46 }
0x115d   :  { %4263 = vmatprep.subr.bf16.mxu1 %v4389_v1 }
0x122a   :  { %v2480_v57 = vpop.f32.mrb[24].mxu1 }
0x122b   :  { %v2481_v48 = vadd.f32 %v5340_v22, %v2480_v57  ;;  %v3895_v55 = vpop.f32.mrb[25].mxu1 }
0x122d   :  { %v2490_v11 = vmul.f32 0.048770577, %v2481_v48 }
0x122f   :  { %v2491_v29 = vadd.f32 %v2490_v11, %v2489_v6 }
0x1231   :  { %v5345_v52 = vsub.f32 %v2491_v29, %v5252_v39  ;;  %v70_v29 = vld [vmem:[%s5642_s25 + $0xe] sm:$0x3]  ;;  %s4396_s25 = smov 64  }
0x1233   :  { %v2494_v50 = vsub.f32 %v5345_v52, %v5248_v59  ;;  %v4317_v59 = vpack.i.bf16 %v4868_v32, %v4768_v25 }
0x1235   :  { %vm2495_vm13 = vcmp.gt.f32.partialorder %v2494_v50, 0.0  ;;  %v2678_v50 = vpop.permute.xlu1 %2677 }
0x1236   :  { %v5350_v8 = vsel %vm2495_vm13, 1.0, %v4391_v7 }
0x1237   :  { %2769 = vrot.lane.b32.xlu0 %v5350_v8, %s4392_s2  ;;  %v2847_v16 = vmul.f32 0.0016652786, %v5350_v8  ;;  %v2501_v26 = vsel %vm214_vm3, %v5350_v8, %v2499_v35 }
0x1238   :  { %3913 = vmatmul.mubr.msk.f32.vlgmr.msra.gmra.mrb[26].mxu0 %vm222_vm5, %v2501_v26 }
0x1239   :  { %v5359_v39 = vadd.f32 %v2847_v16, %v2846_v34  ;;  %4274 = vmatpush3.bf16.msra.mxu0 %v4553_v14  ;;  %3957 = vmatprep.mubr.msk.f32.mxu0 %vm4390_vm0, %v4391_v7 }
0x123a   :  { %4275 = vmatprep.subr.bf16.mxu0 %v4389_v1 }
0x123b   :  { %4318 = vrot.lane.b32.xlu0 %v4317_v59, %s4393_s4 }
0x123d   :  { %4277 = vmatpush3.bf16.msra.mxu0 %v4576_v21 }
0x123e   :  { %4278 = vmatprep.subr.bf16.mxu0 %v4389_v1 }
0x123f   :  { %4328 = vrot.lane.b32.xlu0 %v4327_v0, %s4393_s4 }
0x1241   :  { %4280 = vmatpush3.bf16.msra.mxu0 %v4586_v24  ;;  %v5390_v24 = vld [vmem:[%s5620_s8] ss:$0 sm:$0xff] }
0x1242   :  { %4281 = vmatprep.subr.bf16.mxu0 %v4389_v1  ;;  %v2297_v25 = vadd.f32 %v5390_v24, %v5310_v61  ;;  %v2580_v61 = vmul.f32 0.95122945, %v5266_v17  ;;  %v484_v16 = vadd.f32 %v5390_v24, %v4791_v18  ;;  %v1211_v26 = vadd.f32 %v5390_v24, %v4993_v54 }
0x1243   :  { %491 = vrot.lane.b32.xlu0 %v4757_v10, %s4394_s3 }
0x1245   :  { %4283 = vmatpush3.bf16.msra.mxu0 %v4603_v28  ;;  %v1935_v28 = vadd.f32 %v5390_v24, %v5195_v38 }
0x1246   :  { %4296 = vmatprep.subr.bf16.mxu0 %v4389_v1 }
0x1247   :  { %1218 = vrot.lane.b32.xlu0 %v4959_v62, %s4394_s3 }
0x124b   :  { %1942 = vrot.lane.b32.xlu0 %v5161_v40, %s4394_s3 }
0x12a9   :  { %v5383_v14 = vpop.permute.xlu0 %2769 }
0x12ad   :  { %v5385_v21 = vpop.permute.xlu0 %4318 }
0x12ae   :  { %v4320_v35 = vunpack.i.l.bf16 %v5385_v21  ;;  %v4321_v59 = vunpack.i.h.bf16 %v5385_v21 }
0x12b1   :  { %v4329_v10 = vpop.permute.xlu0 %4328 }
0x12b2   :  { %v4331_v32 = vunpack.i.h.bf16 %v4329_v10  ;;  %v4330_v62 = vunpack.i.l.bf16 %v4329_v10  ;;  %v849_v10 = vadd.f32 %v5390_v24, %v4894_v41 }
0x12b4   :  { %v5397_v40 = vsel %vm498_vm14, %v1935_v28, %v4330_v62  ;;  %v5400_v36 = vsel %vm498_vm14, %v2297_v25, %v4331_v32  ;;  %v499_v28 = vsel %vm498_vm14, %v484_v16, %v4320_v35 }
0x130b   :  { %v2571_v53 = vpop.f32.mrb[26].mxu0 }
0x130c   :  { %v2572_v38 = vadd.f32 %v5405_v31, %v2571_v53  ;;  %v3914_v57 = vpop.f32.mrb[27].mxu0  ;;  %v3060_v53 = vlaneseq }
0x130e   :  { %v2581_v48 = vmul.f32 0.048770577, %v2572_v38  ;;  %v863_v38 = vsel %vm498_vm14, %v849_v10, %v4321_v59  ;;  %v2757_v59 = vmul.f32 1.8, %v5332_v27 }
0x1310   :  { %v2582_v55 = vadd.f32 %v2581_v48, %v2580_v61  ;;  %v1573_v48 = vadd.f32 %v5390_v24, %v5096_v5  ;;  %v2758_v10 = vadd.f32 0.01, %v2757_v59 }
0x1312   :  { %v5410_v6 = vsub.f32 %v2582_v55, %v5298_v47 }
0x1314   :  { %2666 = vrot.lane.b32.xlu0 %v5410_v6, %s4394_s3  ;;  %3924 = vmatmul.mubr.msk.f32.vlgmr.msra.gmra.mrb[26].mxu1 %vm214_vm3, %v5410_v6  ;;  %v2585_v11 = vsub.f32 %v5410_v6, %v5292_v37 }
0x1315   :  { %4265 = vmatpush3.bf16.msra.mxu1 %v4517_v4  ;;  %3938 = vmatprep.mubr.msk.f32.mxu1 %vm4390_vm0, %v4391_v7  ;;  %v4322_v4 = vpack.i.bf16 %v5070_v44, %v4970_v2 }
0x1316   :  { %4266 = vmatprep.subr.bf16.mxu1 %v4389_v1  ;;  %vm2586_vm15 = vcmp.gt.f32.partialorder %v2585_v11, 0.0 }
0x1317   :  { %v5423_v47 = vsel %vm2586_vm15, 1.0, %v4391_v7 }
0x1318   :  { %495 = vrot.lane.b32.xlu0 %v4752_v58, %s4395_s6  ;;  %2860 = vrot.lane.b32.xlu1 %v5423_v47, %s4392_s2 }
0x1319   :  { %4268 = vmatpush3.bf16.msra.mxu1 %v4536_v9  ;;  %v2680_v9 = vsel %vm114_vm1, %v70_v29, %v2678_v50  ;;  %vm500_vm1 = vcmask 293888   ;;  %v3061_v50 = vshrl.u32 %v3060_v53, 7 }
0x131a   :  { %4269 = vmatprep.subr.bf16.mxu1 %v4389_v1 }
0x131c   :  { %1222 = vrot.lane.b32.xlu0 %v4954_v45, %s4395_s6  ;;  %4323 = vrot.lane.b32.xlu1 %v4322_v4, %s4393_s4 }
0x131d   :  { %4271 = vmatpush3.bf16.msra.mxu1 %v4556_v15  ;;  %v2938_v15 = vmul.f32 0.0016652786, %v5423_v47 }
0x131e   :  { %4284 = vmatprep.subr.bf16.mxu1 %v4389_v1 }
0x1320   :  { %3939 = vmatmul.mubr.msk.f32.vlgmr.msra.gmra.mrb[28].mxu1 %vm122_vm2, %v2680_v9  ;;  %1946 = vrot.lane.b32.xlu0 %v5156_v51, %s4395_s6  ;;  %vm502_vm2 = vcmask 556032  }
0x1321   :  { %856 = vrot.lane.b32.xlu1 %v4857_v30, %s4394_s3  ;;  %4286 = vmatpush3.bf16.msra.mxu1 %v4626_v43  ;;  %v2937_v43 = vmul.f32 0.9983347, %v5283_v13 }
0x1322   :  { %4287 = vmatprep.subr.bf16.mxu1 %v4389_v1  ;;  %3976 = vmatprep.mubr.msk.f32.mxu1 %vm4390_vm0, %v4391_v7 }
0x1324   :  { %2670 = vrot.lane.b32.xlu0 %v5292_v37, %s4395_s6 }
0x1325   :  { %1580 = vrot.lane.b32.xlu1 %v5059_v56, %s4394_s3  ;;  %4289 = vmatpush3.bf16.msra.mxu1 %v4654_v60  ;;  %v5468_v60 = vadd.f32 %v2938_v15, %v2937_v43 }
0x1326   :  { %4290 = vmatprep.subr.bf16.mxu1 %v4389_v1 }
0x1329   :  { %2304 = vrot.lane.b32.xlu1 %v5266_v17, %s4394_s3  ;;  %4292 = vmatpush3.bf16.msra.mxu1 %v4664_v63  ;;  %v2940_v63 = vmul.f32 1.8, %v5468_v60 }
0x132a   :  { %4293 = vmatprep.subr.bf16.mxu1 %v4389_v1 }
0x132b   :  { %v5475_v58 = vadd.f32 0.01, %v2940_v63 }
0x132d   :  { %860 = vrot.lane.b32.xlu1 %v4852_v19, %s4395_s6  ;;  %4295 = vmatpush3.bf16.msra.mxu1 %v4674_v3  ;;  %v492_v3 = vpop.permute.xlu0 %491 }
0x132e   :  { %v501_v62 = vsel %vm500_vm1, %v499_v28, %v492_v3 }
0x1331   :  { %1584 = vrot.lane.b32.xlu1 %v5054_v33, %s4395_s6  ;;  %v1219_v19 = vpop.permute.xlu0 %1218 }
0x1335   :  { %2308 = vrot.lane.b32.xlu1 %v5261_v49, %s4395_s6  ;;  %v1943_v30 = vpop.permute.xlu0 %1942 }
0x1336   :  { %v1950_v51 = vsel %vm500_vm1, %v5397_v40, %v1943_v30  ;;  %v4397_v40 = vmov 1983009808  }
0x1337   :  { %v3058_v18 = vunpack.c.l.s4 %v4397_v40  ;;  %v2762_v40 = vmul.f32 %v5320_v23, %v2758_v10 }
0x1339   :  { %3108 = vrot.lane.b32.xlu1 %v5332_v27, %s4396_s25  ;;  %v3059_v11 = vunpack.c.0.s8 %v3058_v18 }
0x133b   :  { %v5514_v30 = vsub.s32 %v3059_v11, %v3061_v50 }
0x133d   :  { %3032 = vrot.lane.b32.xlu1 %v5475_v58, %s4395_s6 }
0x1386   :  { %v5479_v45 = vpop.permute.xlu0 %2666 }
0x138a   :  { %v496_v2 = vpop.permute.xlu0 %495  ;;  %v5481_v33 = vpop.permute.xlu1 %2860 }
0x138b   :  { %v503_v54 = vsel %vm502_vm2, %v501_v62, %v496_v2 }
0x138c   :  { %v3039_v55 = vsel %vm3038_vm4, %v503_v54, 0.0 }
0x138e   :  { %v1223_v56 = vpop.permute.xlu0 %1222  ;;  %v4324_v44 = vpop.permute.xlu1 %4323 }
0x138f   :  { %v4325_v34 = vunpack.i.l.bf16 %v4324_v44  ;;  %v4326_v21 = vunpack.i.h.bf16 %v4324_v44 }
0x1391   :  { %v1225_v25 = vsel %vm498_vm14, %v1211_v26, %v4325_v34  ;;  %v1587_v29 = vsel %vm498_vm14, %v1573_v48, %v4326_v21 }
0x1392   :  { %v1947_v49 = vpop.permute.xlu0 %1946  ;;  %v1226_v61 = vsel %vm500_vm1, %v1225_v25, %v1219_v19 }
0x1393   :  { %v1951_v17 = vsel %vm502_vm2, %v1950_v51, %v1947_v49  ;;  %v857_v13 = vpop.permute.xlu1 %856  ;;  %v1227_v15 = vsel %vm502_vm2, %v1226_v61, %v1223_v56 }
0x1394   :  { %v864_v41 = vsel %vm500_vm1, %v863_v38, %v857_v13  ;;  %v3041_v5 = vsel %vm3038_vm4, %v1227_v15, 0.0  ;;  %v5520_v56 = vsel %vm3038_vm4, %v1951_v17, 0.0  ;;  %v2759_v17 = vmul.f32 0.95122945, %v5315_v20 }
0x1397   :  { %v1581_v37 = vpop.permute.xlu1 %1580 }
0x1398   :  { %v1588_v43 = vsel %vm500_vm1, %v1587_v29, %v1581_v37 }
0x139b   :  { %v2305_v0 = vpop.permute.xlu1 %2304 }
0x139c   :  { %v2312_v32 = vsel %vm500_vm1, %v5400_v36, %v2305_v0 }
0x139f   :  { %v861_v57 = vpop.permute.xlu1 %860 }
0x13a0   :  { %v865_v36 = vsel %vm502_vm2, %v864_v41, %v861_v57 }
0x13a1   :  { %v3040_v4 = vsel %vm3038_vm4, %v865_v36, 0.0 }
0x13a2   :  { %v3055_v9 = vcombine.low %v3039_v55, %v3040_v4  ;;  %v2942_v55 = vmul.f32 0.95122945, %v5410_v6  ;;  %v2945_v4 = vmul.f32 %v5423_v47, %v5475_v58 }
0x13a3   :  { %v1585_v63 = vpop.permute.xlu1 %1584 }
0x13a4   :  { %v1589_v3 = vsel %vm502_vm2, %v1588_v43, %v1585_v63  ;;  %v3063_v51 = vrot.slane %v3055_v9, %v5514_v30  ;;  %v2671_v9 = vpop.permute.xlu0 %2670 }
0x13a5   :  { %v3042_v19 = vsel %vm3038_vm4, %v1589_v3, 0.0 }
0x13a6   :  { %v3056_v2 = vcombine.low %v3041_v5, %v3042_v19 }
0x13a7   :  { %v2309_v44 = vpop.permute.xlu1 %2308 }
0x13a8   :  { %v3070_v49 = vrot.slane %v3056_v2, %v5514_v30  ;;  %v2313_v13 = vsel %vm502_vm2, %v2312_v32, %v2309_v44 }
0x13a9   :  { %v5523_v37 = vsel %vm3038_vm4, %v2313_v13, 0.0 }
0x13aa   :  { %v3072_v35 = vcombine.low %v5520_v56, %v5523_v37  ;;  %v3071_v34 = vcombine.low %v3063_v51, %v3070_v49 }
0x13ab   :  { %v3109_v50 = vpop.permute.xlu1 %3108 }
0x13ac   :  { %3091 = vst [vmem:[#allocation2] sm:$0xff] %v3071_v34 }
0x13af   :  { %v3033_v15 = vpop.permute.xlu1 %3032 }
0x13e7   :  { %v5527_v16 = vpop.f32.mrb[26].mxu1 }
0x13e8   :  { %v3925_v26 = vpop.f32.mrb[27].mxu1 }
0x13f3   :  { %v2750_v0 = vpop.f32.mrb[28].mxu1 }
0x13f4   :  { %v2751_v28 = vadd.f32 %v5200_v12, %v2750_v0  ;;  %v3940_v25 = vpop.f32.mrb[29].mxu1  ;;  %v2849_v12 = vmul.f32 1.8, %v5359_v39  ;;  %v3139_v0 = vrot.slane %v5468_v60, %v5514_v30 }
0x13f6   :  { %v2760_v32 = vmul.f32 0.048770577, %v2751_v28  ;;  %v2850_v38 = vadd.f32 0.01, %v2849_v12 }
0x13f8   :  { %v2761_v62 = vadd.f32 %v2760_v32, %v2759_v17 }
0x13fa   :  { %v2763_v18 = vsub.f32 %v2761_v62, %v2762_v40 }
0x13fc   :  { %v2764_v53 = vsub.f32 %v2763_v18, %v2758_v10 }
0x13fe   :  { %vm2765_vm6 = vcmp.gt.f32.partialorder %v2764_v53, 0.0 }
0x13ff   :  { %v3232_v54 = vsel %vm2765_vm6, 1.0, %v4391_v7 }
0x1400   :  { %v2772_v21 = vsel %vm214_vm3, %v3232_v54, %v5383_v14  ;;  %v2851_v14 = vmul.f32 0.95122945, %v5345_v52 }
0x1401   :  { %3958 = vmatmul.mubr.msk.f32.vlgmr.msra.gmra.mrb[28].mxu0 %vm222_vm5, %v2772_v21 }
0x1402   :  { %4298 = vmatpush3.bf16.msra.mxu0 %v4723_v42  ;;  %3987 = vmatprep.mubr.msk.f32.mxu0 %vm4390_vm0, %v4391_v7  ;;  %v2854_v42 = vmul.f32 %v5350_v8, %v2850_v38 }
0x1403   :  { %4299 = vmatprep.subr.bf16.mxu0 %v4389_v1 }
0x1406   :  { %4301 = vmatpush3.bf16.msra.mxu0 %v4733_v46 }
0x14d4   :  { %v2842_v20 = vpop.f32.mrb[28].mxu0 }
0x14d5   :  { %v2843_v23 = vadd.f32 %v5340_v22, %v2842_v20  ;;  %v3959_v27 = vpop.f32.mrb[29].mxu0 }
0x14d7   :  { %v2852_v41 = vmul.f32 0.048770577, %v2843_v23 }
0x14d9   :  { %v2853_v57 = vadd.f32 %v2852_v41, %v2851_v14 }
0x14db   :  { %v2855_v61 = vsub.f32 %v2853_v57, %v2854_v42 }
0x14dd   :  { %3094 = vrot.lane.b32.xlu0 %v2855_v61, %s4392_s2  ;;  %v2856_v48 = vsub.f32 %v2855_v61, %v2850_v38 }
0x14df   :  { %vm2857_vm0 = vcmp.gt.f32.partialorder %v2856_v48, 0.0 }
0x14e0   :  { %v3234_v1 = vsel %vm2857_vm0, 1.0, %v4391_v7 }
0x14e1   :  { %v2863_v46 = vsel %vm214_vm3, %v3234_v1, %v5481_v33 }
0x14e2   :  { %3977 = vmatmul.mubr.msk.f32.vlgmr.msra.gmra.mrb[30].mxu1 %vm222_vm5, %v2863_v46 }
0x154f   :  { %v3095_v43 = vpop.permute.xlu0 %3094 }
0x15b5   :  { %v2933_v22 = vpop.f32.mrb[30].mxu1 }
0x15b6   :  { %v2934_v36 = vadd.f32 %v5405_v31, %v2933_v22  ;;  %v3978_v52 = vpop.f32.mrb[31].mxu1 }
0x15b8   :  { %v2943_v11 = vmul.f32 0.048770577, %v2934_v36 }
0x15ba   :  { %v2944_v8 = vadd.f32 %v2943_v11, %v2942_v55 }
0x15bc   :  { %v2946_v29 = vsub.f32 %v2944_v8, %v2945_v4 }
0x15be   :  { %3097 = vrot.lane.b32.xlu0 %v2946_v29, %s4396_s25  ;;  %3028 = vrot.lane.b32.xlu1 %v2946_v29, %s4394_s3  ;;  %v2947_v33 = vsub.f32 %v2946_v29, %v5475_v58 }
0x15bf   :  { %3988 = vmatmul.mubr.msk.f32.vlgmr.msra.gmra.mrb[30].mxu0 %vm214_vm3, %v2946_v29 }
0x15c0   :  { %vm2948_vm7 = vcmp.gt.f32.partialorder %v2947_v33, 0.0 }
0x15c1   :  { %v3236_v31 = vsel %vm2948_vm7, 1.0, %v4391_v7  ;;  %v2659_v7 = vadd.f32 %v5390_v24, %v5527_v16 }
0x15c2   :  { %3101 = vrot.lane.b32.xlu0 %v3232_v54, %s4398_s7  ;;  %v4332_v6 = vpack.i.bf16 %v3236_v31, %v5423_v47 }
0x15c4   :  { %4333 = vrot.lane.b32.xlu1 %v4332_v6, %s4393_s4 }
0x15c8   :  { %3104 = vrot.lane.b32.xlu1 %v3236_v31, %s4392_s2  ;;  %s4399_s2 = smov [#allocation4]  }
0x15c9   :  { %s3166_s30 = sshll.u32 %s4399_s2, 4  ;;  %s3167_s30 = int_to_ptr.vmem [resolvable:$true] %s3166_s30 }
0x15ca   :  { %s4340_s11 = scalar_lea.vmem %s3167_s30, 96  ;;  %p4345_p1 = scmp.lt.s32.totalorder %s3167_s30, %s3167_s30 }
0x15cb   :  { %p4341_p0 = scmp.ne.s32.totalorder %s3167_s30, %s4340_s11  ;;  %p4346_p2 = scmp.lt.s32.totalorder %s4340_s11, %s4340_s11 }
0x15cc   :  { %3112 = vrot.lane.b32.xlu1 %v5359_v39, %s4398_s7  ;;  %v3115_v39 = vsel %vm214_vm3, %v2763_v18, %v3095_v43 }
0x15cd   :  { %p4347_p3 = por %p4346_p2, %p4345_p1 }
0x15cf   :  { %p4348_p4 = pnand %p4347_p3, %p4341_p0 }
0x1630   :  { %v3029_v58 = vpop.permute.xlu1 %3028  ;;  %v3098_v63 = vpop.permute.xlu0 %3097 }
0x1631   :  { %v3116_v51 = vsel %vm222_vm5, %v3115_v39, %v3098_v63 }
0x1634   :  { %v3102_v44 = vpop.permute.xlu0 %3101 }
0x1635   :  { %v3118_v34 = vsel %vm3117_vm8, %v3116_v51, %v3102_v44 }
0x1636   :  { %v4334_v3 = vpop.permute.xlu1 %4333 }
0x1637   :  { %v4335_v5 = vunpack.i.l.bf16 %v4334_v3 }
0x1639   :  { %v2673_v19 = vsel %vm498_vm14, %v2659_v7, %v4335_v5 }
0x163a   :  { %v3105_v47 = vpop.permute.xlu1 %3104 }
0x163b   :  { %v3119_v2 = vsel %vm214_vm3, %v3234_v1, %v3105_v47  ;;  %vm3146_vm3 = vmor %vm3145_vm12, %vm3144_vm11 }
0x163c   :  { %v3120_v49 = vsel %vm222_vm5, %v3119_v2, %v3109_v50 }
0x163e   :  { %v3113_v13 = vpop.permute.xlu1 %3112 }
0x163f   :  { %v3121_v26 = vsel %vm3117_vm8, %v3120_v49, %v3113_v13 }
0x1640   :  { %v3125_v16 = vcombine.low %v3118_v34, %v3121_v26 }
0x1642   :  { %v3132_v59 = vrot.slane %v3125_v16, %v5514_v30 }
0x1644   :  { %v3140_v10 = vcombine.low %v3132_v59, %v3139_v0 }
0x1646   :  { %3147 = vst.msk [vmem:[#allocation4] sm:$0x3f] %vm3146_vm3, %v3140_v10 }
0x1647   :  { %4351 = shalt.err (!%p4348_p4)
}
0x1648   :  { %s4352_s1 = scalar_lea.hbm %s5631_s19, 96 }
0x1649   :  { %p4353_p5 = scmp.ne.s32.totalorder %s5631_s19, %s4352_s1  ;;  %p4356_p6 = scmp.lt.u32.totalorder %s4352_s1, %s5631_s19 }
0x164b   :  { %p4358_p7 = pnand %p4356_p6, %p4353_p5 }
0x164d   :  { %4361 = shalt.err (!%p4358_p7)
}
0x164e   :  { %3169 = dma.vmem_to_hbm [thread:$0]  %s3167_s30, 96, %s5631_s19, [#allocation5]   ;;  %v2674_v60 = vsel %vm500_vm1, %v2673_v19, %v5479_v45  ;;  %v4336_v25 = vunpack.i.h.bf16 %v4334_v3 }
0x164f   :  { %v2675_v62 = vsel %vm502_vm2, %v2674_v60, %v2671_v9  ;;  %s4400_s19 = smov [#allocation2]  }
0x1650   :  { %v3045_v21 = vsel %vm3038_vm4, %v2675_v62, 0.0  ;;  %s3153_s23 = sshll.u32 %s4400_s19, 4  ;;  %s3154_s23 = int_to_ptr.vmem [resolvable:$true] %s3153_s23 }
0x1651   :  { %s4362_s24 = scalar_lea.vmem %s3154_s23, 256  ;;  %p4367_p9 = scmp.lt.s32.totalorder %s3154_s23, %s3154_s23 }
0x1652   :  { %p4363_p8 = scmp.ne.s32.totalorder %s3154_s23, %s4362_s24  ;;  %p4368_p10 = scmp.lt.s32.totalorder %s4362_s24, %s4362_s24 }
0x1654   :  { %p4369_p11 = por %p4368_p10, %p4367_p9 }
0x1656   :  { %p4370_p12 = pnand %p4369_p11, %p4363_p8 }
0x1692   :  { %v3020_v28 = vpop.f32.mrb[30].mxu0 }
0x1693   :  { %v3021_v17 = vadd.f32 %v5390_v24, %v3020_v28  ;;  %v3989_v32 = vpop.f32.mrb[31].mxu0  ;;  %v3080_v24 = vrot.slane %v3072_v35, %v5514_v30 }
0x1695   :  { %v3035_v40 = vsel %vm498_vm14, %v3021_v17, %v4336_v25 }
0x1696   :  { %v3036_v18 = vsel %vm500_vm1, %v3035_v40, %v3029_v58 }
0x1697   :  { %v3037_v53 = vsel %vm502_vm2, %v3036_v18, %v3033_v15 }
0x1698   :  { %v3046_v54 = vsel %vm3038_vm4, %v3037_v53, 0.0 }
0x1699   :  { %v3073_v12 = vcombine.low %v3045_v21, %v3046_v54 }
0x169b   :  { %v3087_v45 = vrot.slane %v3073_v12, %v5514_v30 }
0x169d   :  { %v3088_v20 = vcombine.low %v3080_v24, %v3087_v45 }
0x169f   :  { %3092 = vst [vmem:[#allocation2 + $0x8] sm:$0xff] %v3088_v20 }
0x16a0   :  { %4373 = shalt.err (!%p4370_p12)
}
0x16a1   :  { %s4374_s20 = scalar_lea.hbm %s5630_s18, 256 }
0x16a2   :  { %p4375_p13 = scmp.ne.s32.totalorder %s5630_s18, %s4374_s20  ;;  %p4378_p0 = scmp.lt.u32.totalorder %s4374_s20, %s5630_s18 }
0x16a4   :  { %p4380_p1 = pnand %p4378_p0, %p4375_p13 }
0x16a6   :  { %4383 = shalt.err (!%p4380_p1)
}
0x16a7   :  { %s4401_s26 = smov 128   ;;  %s4402_s27 = smov 8  }
0x16a8   :  { %3159 = dma.vmem_to_hbm [thread:$0]  %s3154_s23, 256, %s5630_s18, [#allocation3], %s4401_s26, %s4401_s26, %s4402_s27  }
0x16a9   :  { %4384 = dma.done.wait [#allocation3], 256  }
0x16aa   :  { %4385 = vsyncadd [#allocation3], 4294967040 }
0x16ab   :  { %4386 = dma.done.wait [#allocation5], 96  }
0x16ac   :  { %4387 = vsyncadd [#allocation5], 4294967200 }
0x16ad   :  { %3176 = vsyncpa [#allocation3], 1 }
0x16ae   :  { %3177 = vsyncpa [#allocation5], 1 }

</bundles_post_ra>
